<compile_context>
chip_gen: v7x
topology: tpu7x:2x2x1
jax: 0.10.0
libtpu: 0.0.40
codegen_flags: <defaults>
</compile_context>

<pallas_src>
import math

import jax
import jax.numpy as jnp
from jax.experimental import pallas as pl
from jax.experimental.pallas import tpu as pltpu

# ---- problem sizes (small, consistent with the module) ----------------------
BS, N = 2, 8
DX, DE, DY = 32, 16, 16
NHEAD = 4
DF = DX // NHEAD

NDE = N * DE          # 128  (lane-dense edge row width)
NDX = N * DX          # 256

# (name, in_features, out_features) for every nn.Linear in the module.
LINEAR_DEFS = [
    ("q", DX, DX), ("k", DX, DX), ("v", DX, DX),
    ("em", DE, DX), ("ea", DE, DX),          # e_mul, e_add
    ("yem", DY, DX), ("yea", DY, DX),        # y_e_mul, y_e_add
    ("yxm", DY, DX), ("yxa", DY, DX),        # y_x_mul, y_x_add
    ("yy", DY, DY),
    ("xy", 4 * DX, DY),                      # Xtoy.lin
    ("ey", 4 * DE, DY),                      # Etoy.lin
    ("xo", DX, DX), ("eo", DX, DE),          # x_out, e_out
    ("y1", DY, DY), ("y2", DY, DY),          # y_out MLP
]


def init_params(key):
    """Deterministic PyTorch-Linear-style init: U(-1/sqrt(fan_in), 1/sqrt(fan_in))."""
    params = {}
    keys = jax.random.split(key, len(LINEAR_DEFS))
    for k, (name, din, dout) in zip(keys, LINEAR_DEFS):
        kw, kb = jax.random.split(k)
        bound = 1.0 / math.sqrt(din)
        params["W" + name] = jax.random.uniform(kw, (din, dout), jnp.float32, -bound, bound)
        params["b" + name] = jax.random.uniform(kb, (1, dout), jnp.float32, -bound, bound)
    return params


# ---- one-time, host-side weight packing (NOT in the jitted forward) ----------
def _pad_cols(m, width):
    return jnp.concatenate(
        [m, jnp.zeros((m.shape[0], width - m.shape[1]), jnp.float32)], axis=1)


def _blockdiag(w, nblk):
    r, c = w.shape
    out = jnp.zeros((nblk * r, nblk * c), jnp.float32)
    for j in range(nblk):
        out = out.at[j * r:(j + 1) * r, j * c:(j + 1) * c].set(w)
    return out


def pack_weights(p):
    """Pack all weights/biases into 3 slabs, precomposing output projections."""
    # 1) block-diagonal e_mul | e_add : (n*de, 2*n*dx) = (128, 512)
    w_e_bd = jnp.concatenate([_blockdiag(p["Wem"], N), _blockdiag(p["Wea"], N)], axis=1)

    # 2) w_out (256, 176): [blockdiag(e_out) | vstack8(x_out) | stats/MLP column]
    weo_bd = _blockdiag(p["Weo"], N)                                   # (256, 128)
    wxo_st = jnp.tile(p["Wxo"], (N, 1))                                # (256, 32)
    stats_col = jnp.concatenate(
        [p["Wxy"], p["Wey"], p["Wy1"], p["Wy2"],
         jnp.zeros((32, DY), jnp.float32)], axis=0)                    # (256, 16)
    w_out = jnp.concatenate([weo_bd, wxo_st, stats_col], axis=1)       # (256, 176)

    # 3) w_misc (56, 256): QKV weights, fused y-projection weights, all biases.
    wqkv = jnp.concatenate([p["Wq"], p["Wk"], p["Wv"]], axis=1)        # (32, 96)
    w16 = jnp.concatenate(
        [p["Wyem"], p["Wyxm"], p["Wyy"],
         p["Wyea"] @ p["Weo"],                                         # y_e_add @ e_out
         p["Wyxa"] @ p["Wxo"]], axis=1)                                # (16, 128)
    b16 = jnp.concatenate(
        [p["byem"], p["byxm"], p["byy"],
         p["byea"] @ p["Weo"] + p["beo"],
         p["byxa"] @ p["Wxo"] + p["bxo"]], axis=1)                     # (1, 128)
    b_qkv = jnp.concatenate([p["bq"], p["bk"], p["bv"]], axis=1)       # (1, 96)
    bem_t = jnp.tile(p["bem"], (1, N))                                 # (1, 256)
    bea_t = jnp.tile(p["bea"], (1, N))                                 # (1, 256)
    b_xe = p["bxy"] + p["bey"]                                         # (1, 16)
    bias_row3 = _pad_cols(
        jnp.concatenate([b16, b_xe, p["by1"], p["by2"]], axis=1), 256)  # (1, 256)
    w_misc = jnp.concatenate(
        [_pad_cols(wqkv, 256),                 # rows 0:32
         _pad_cols(w16, 256),                  # rows 32:48
         _pad_cols(b_qkv, 256),                # row 48
         bem_t,                                # row 49
         bea_t,                                # row 50
         bias_row3,                            # row 51
         jnp.zeros((4, 256), jnp.float32)], axis=0)                    # (56, 256)

    return w_e_bd, w_out, w_misc


# ---- Pallas kernel -----------------------------------------------------------
def node_edge_kernel(acts_ref, webd_ref, wout_ref, wmisc_ref, out_ref):
    bs, n, dx, de, dy = BS, N, DX, DE, DY
    nde, ndx = NDE, NDX
    f32 = jnp.float32

    # ---- unpack the activation slab (one DMA) ----
    Xf = acts_ref[:, 0:dx]                       # (16, 32)
    x_mask = acts_ref[:, 32:33]                  # (16, 1)
    y_rows = acts_ref[:, 64:64 + dy]             # (16, 16)  y[b] broadcast per row
    E_ld = acts_ref[:, 128:128 + nde]            # (16, 128) lane-dense edges (j, de)

    # ---- unpack weights / biases ----
    w_e_bd = webd_ref[...]                       # (128, 512)
    w_eo_bd = wout_ref[:, 0:nde]                 # (256, 128)
    w_xo_st = wout_ref[:, nde:nde + dx]          # (256, 32)
    w_xe = wout_ref[0:192, 160:176]              # (192, 16)
    w_y1 = wout_ref[192:208, 160:176]            # (16, 16)
    w_y2 = wout_ref[208:224, 160:176]            # (16, 16)
    w_qkv = wmisc_ref[0:32, 0:96]                # (32, 96)
    w_16 = wmisc_ref[32:48, 0:128]               # (16, 128)
    bias_blk = wmisc_ref[48:56, :]               # (8, 256)
    b_qkv = bias_blk[0:1, 0:96]
    b_em_t = bias_blk[1:2, 0:256]
    b_ea_t = bias_blk[2:3, 0:256]
    b_16 = bias_blk[3:4, 0:128]
    b_xe = bias_blk[3:4, 128:144]
    b_y1 = bias_blk[3:4, 144:160]
    b_y2 = bias_blk[3:4, 160:176]

    def dot(a, b):
        return jnp.dot(a, b, preferred_element_type=jnp.float32)

    def to_lane_blocks(t, bw):
        # t: (bs*n, w) with rows (b, j) -> (bs*n, n*bw) where, for every row
        # (b, i), lane block j holds t[b*n + j] broadcast to width bw.
        t3 = t.reshape(bs, n, t.shape[-1])
        pieces = [jnp.broadcast_to(t3[:, j:j + 1, :], (bs, n, bw)) for j in range(n)]
        return jnp.concatenate(pieces, axis=-1).reshape(bs * n, n * bw)

    # ---- fused node projections: one (16, 32) @ (32, 96) matmul -------------
    qkv = (dot(Xf, w_qkv) + b_qkv) * x_mask
    Q = qkv[:, 0:dx]
    K = qkv[:, dx:2 * dx]
    V = qkv[:, 2 * dx:3 * dx]
    Qt = jnp.concatenate([Q] * n, axis=-1)       # (16, 256) lanes (j, c) = Q[b,i,c]
    K_b = to_lane_blocks(K, dx)                  # (16, 256) lanes (j, c) = K[b,j,c]
    V_b = to_lane_blocks(V, dx)                  # (16, 256)

    # key masks in lane-dense layout, rebuilt in-kernel from node_mask
    km_dx = to_lane_blocks(x_mask, dx)           # (16, 256) = m[b, j]
    km_de = to_lane_blocks(x_mask, de)           # (16, 128)
    emask_dx = x_mask * km_dx                    # m[b,i] * m[b,j]

    # ---- edge projections: block-diagonal (de -> dx per j), lane-dense ------
    e_proj = dot(E_ld, w_e_bd)                   # (16, 512)
    E1 = (e_proj[:, 0:ndx] + b_em_t) * emask_dx          # e_mul
    E2 = (e_proj[:, ndx:2 * ndx] + b_ea_t) * emask_dx    # e_add

    # ---- attention scores, lane (j, c) of row (b, i) -------------------------
    Y = Qt * K_b * (1.0 / math.sqrt(DF))
    Y = Y * (E1 + 1.0) + E2                      # (16, 256)

    # ---- FiLM factors from y (per-row broadcast, one fused matmul) ----------
    yf = dot(y_rows, w_16) + b_16                # (16, 128)
    ye_mul = yf[:, 0:dx]
    yx_mul = yf[:, dx:2 * dx]
    y_yy = yf[:, 2 * dx:2 * dx + dy]             # y @ Wyy + byy
    yeaeo = yf[:, 80:96]                         # y_e_add @ e_out + b_eo
    yxao = yf[:, 96:128]                         # y_x_add @ x_out + b_xo
    ye_mul_t = jnp.concatenate([ye_mul] * n, axis=-1)    # (16, 256)
    yx_mul_t = jnp.concatenate([yx_mul] * n, axis=-1)    # (16, 256)
    yeaeo_t = jnp.concatenate([yeaeo] * n, axis=-1)      # (16, 128)

    # ---- new edge features (block-diagonal e_out -> lane-dense directly) ----
    M = (ye_mul_t + 1.0) * Y
    newE = (dot(M, w_eo_bd) + yeaeo_t) * (x_mask * km_de)    # (16, 128)

    # ---- masked softmax over keys j (lane-stride dx groups, roll tree) ------
    neg = jnp.float32(-1e30)     # finite sentinel: NaN-free for fully masked rows
    Ym = jnp.where(km_dx > 0.0, Y, neg)
    mx = Ym
    for s in (dx, 2 * dx, 4 * dx):
        mx = jnp.maximum(mx, pltpu.roll(mx, shift=s, axis=1))
    P = jnp.exp(Ym - mx)
    den = P
    for s in (dx, 2 * dx, 4 * dx):
        den = den + pltpu.roll(den, shift=s, axis=1)
    attn = P * pl.reciprocal(den, approx=False)              # (16, 256)

    # ---- weighted V + FiLM; sum over j folded into the stacked x_out weight -
    A = attn * V_b * (yx_mul_t + 1.0)
    newX = (dot(A, w_xo_st) + yxao) * x_mask                 # (16, 32)

    # ---- global feature update ----------------------------------------------
    X3 = Xf.reshape(bs, n, dx)
    xmean = jnp.mean(X3, axis=1)
    xmin = jnp.min(X3, axis=1)
    xmax = jnp.max(X3, axis=1)
    xstd = jnp.sqrt(jnp.sum((X3 - xmean[:, None, :]) ** 2, axis=1) / (n - 1))

    E3 = E_ld.reshape(bs, n, nde)                # rows i, lanes (j, e)

    def roll_reduce(t, op):                      # reduce over j (lane stride de)
        r = t
        for s in (de, 2 * de, 4 * de):
            r = op(r, pltpu.roll(r, shift=s, axis=1))
        return r

    esum = roll_reduce(jnp.sum(E3, axis=1), jnp.add)         # (2, 128)
    emean = esum * (1.0 / (n * n))
    emin = roll_reduce(jnp.min(E3, axis=1), jnp.minimum)
    emax = roll_reduce(jnp.max(E3, axis=1), jnp.maximum)
    edev = E3 - emean[:, None, :]
    essq = roll_reduce(jnp.sum(edev * edev, axis=1), jnp.add)
    estd = jnp.sqrt(essq * (1.0 / (n * n - 1)))

    z2 = jnp.concatenate(
        [xmean, xmin, xmax, xstd,
         emean[:, 0:de], emin[:, 0:de], emax[:, 0:de], estd[:, 0:de]], axis=-1)  # (2, 192)
    z2_rows = jnp.broadcast_to(z2[:, None, :], (bs, n, 192)).reshape(bs * n, 192)

    new_y = y_yy + dot(z2_rows, w_xe) + b_xe                 # (16, 16)
    hidden = jnp.maximum(dot(new_y, w_y1) + b_y1, 0.0)
    new_y = dot(hidden, w_y2) + b_y2                         # (16, 16)

    # ---- single lane-dense output store --------------------------------------
    pad = jnp.zeros((bs * n, 256 - (nde + dx + dy)), f32)
    out_ref[...] = jnp.concatenate([newE, newX, new_y, pad], axis=-1)


# ---- wrapper (weights are pre-packed outside; only activations packed here) --
@jax.jit
def node_edge_block(packed, X, E, y, node_mask):
    w_e_bd, w_out, w_misc = packed
    bs, n, dx = X.shape
    de = E.shape[-1]
    dy = y.shape[-1]

    xm = node_mask.astype(jnp.float32)
    y_rows = jnp.broadcast_to(y[:, None, :], (bs, n, dy)).reshape(bs * n, dy)
    acts = jnp.concatenate(
        [X.reshape(bs * n, dx),
         xm.reshape(bs * n, 1),
         jnp.zeros((bs * n, 31), jnp.float32),
         y_rows,
         jnp.zeros((bs * n, 48), jnp.float32),
         E.reshape(bs * n, n * de)], axis=1)                 # (16, 256)

    out = pl.pallas_call(
        node_edge_kernel,
        out_shape=jax.ShapeDtypeStruct((bs * n, 256), jnp.float32),
    )(acts, w_e_bd, w_out, w_misc)

    newE = out[:, 0:n * de].reshape(bs, n, n, de)
    newX = out[:, n * de:n * de + dx].reshape(bs, n, dx)
    new_y = out.reshape(bs, n, -1)[:, 0, n * de + dx:n * de + dx + dy]
    return newX, newE, new_y


# ---- pure-JAX reference (mirrors the PyTorch forward exactly) -----------------
def reference(params, X, E, y, node_mask):
    p = params
    bs, n, dx = X.shape
    h, df = NHEAD, DF
    x_mask = node_mask.astype(jnp.float32)[..., None]
    e_mask1 = x_mask[:, :, None, :]
    e_mask2 = x_mask[:, None, :, :]

    def lin(a, W, b):
        return a @ W + b

    Q = lin(X, p["Wq"], p["bq"]) * x_mask
    K = lin(X, p["Wk"], p["bk"]) * x_mask
    Qh = Q.reshape(bs, n, h, df)[:, :, None]
    Kh = K.reshape(bs, n, h, df)[:, None]
    Y = Qh * Kh / math.sqrt(df)
    E1 = (lin(E, p["Wem"], p["bem"]) * e_mask1 * e_mask2).reshape(bs, n, n, h, df)
    E2 = (lin(E, p["Wea"], p["bea"]) * e_mask1 * e_mask2).reshape(bs, n, n, h, df)
    Y = Y * (E1 + 1.0) + E2
    newE = Y.reshape(bs, n, n, dx)
    ye1 = lin(y, p["Wyea"], p["byea"])[:, None, None]
    ye2 = lin(y, p["Wyem"], p["byem"])[:, None, None]
    newE = ye1 + (ye2 + 1.0) * newE
    newE = lin(newE, p["Weo"], p["beo"]) * e_mask1 * e_mask2

    mask5 = e_mask2[..., None] > 0
    Ym = jnp.where(mask5, Y, -jnp.inf)
    attn = jax.nn.softmax(Ym, axis=2)
    V = lin(X, p["Wv"], p["bv"]) * x_mask
    Vh = V.reshape(bs, n, h, df)[:, None]
    wV = (attn * Vh).sum(axis=2).reshape(bs, n, dx)
    yx1 = lin(y, p["Wyxa"], p["byxa"])[:, None]
    yx2 = lin(y, p["Wyxm"], p["byxm"])[:, None]
    newX = yx1 + (yx2 + 1.0) * wV
    newX = lin(newX, p["Wxo"], p["bxo"]) * x_mask

    y1 = lin(y, p["Wyy"], p["byy"])
    zx = jnp.concatenate([X.mean(1), X.min(1), X.max(1),
                          jnp.std(X, axis=1, ddof=1)], axis=-1)
    x_y = lin(zx, p["Wxy"], p["bxy"])
    ze = jnp.concatenate([E.mean((1, 2)), E.min((1, 2)), E.max((1, 2)),
                          jnp.std(E, axis=(1, 2), ddof=1)], axis=-1)
    e_y = lin(ze, p["Wey"], p["bey"])
    new_y = y1 + x_y + e_y
    new_y = lin(jnp.maximum(lin(new_y, p["Wy1"], p["by1"]), 0.0), p["Wy2"], p["by2"])
    return newX, newE, new_y


if __name__ == "__main__":
    key = jax.random.PRNGKey(0)
    kx, ke, ky, kp = jax.random.split(key, 4)
    X = jax.random.normal(kx, (BS, N, DX), jnp.float32)
    E = jax.random.normal(ke, (BS, N, N, DE), jnp.float32)
    y = jax.random.normal(ky, (BS, DY), jnp.float32)
    node_mask = jnp.array([[1, 1, 1, 1, 1, 1, 0, 0],
                           [1, 1, 1, 1, 1, 1, 1, 1]], jnp.float32)
    params = init_params(kp)

    packed = pack_weights(params)          # once, OUTSIDE the jitted forward
    packed = jax.block_until_ready(packed)

    newX, newE, new_y = node_edge_block(packed, X, E, y, node_mask)
    jax.block_until_ready((newX, newE, new_y))

    rX, rE, ry = reference(params, X, E, y, node_mask)
    assert jnp.allclose(newX, rX, atol=2e-3, rtol=2e-3), "newX mismatch"
    assert jnp.allclose(newE, rE, atol=2e-3, rtol=2e-3), "newE mismatch"
    assert jnp.allclose(new_y, ry, atol=2e-3, rtol=2e-3), "new_y mismatch"

    print("KERNEL_OK")
</pallas_src>

<mosaic_0001>
module attributes {stable_mosaic.version = 11 : i64} {
  func.func @node_edge_kernel(%arg0: memref<16x256xf32, #tpu.memory_space<vmem>>, %arg1: memref<128x512xf32, #tpu.memory_space<vmem>>, %arg2: memref<256x176xf32, #tpu.memory_space<vmem>>, %arg3: memref<56x256xf32, #tpu.memory_space<vmem>>, %arg4: memref<16x256xf32, #tpu.memory_space<vmem>>) attributes {dimension_semantics = [], scalar_prefetch = 0 : i64, scratch_operands = 0 : i64, tpu.core_type = #tpu.core_type<tc>} {
    %c0 = arith.constant 0 : index
    %c0_0 = arith.constant 0 : index
    %0 = vector.load %arg0[%c0, %c0_0] : memref<16x256xf32, #tpu.memory_space<vmem>>, vector<16x32xf32>
    %c0_1 = arith.constant 0 : index
    %c32 = arith.constant 32 : index
    %1 = vector.load %arg0[%c0_1, %c32] : memref<16x256xf32, #tpu.memory_space<vmem>>, vector<16x1xf32>
    %c0_2 = arith.constant 0 : index
    %c64 = arith.constant 64 : index
    %2 = vector.load %arg0[%c0_2, %c64] : memref<16x256xf32, #tpu.memory_space<vmem>>, vector<16x16xf32>
    %c0_3 = arith.constant 0 : index
    %c128 = arith.constant 128 : index
    %3 = vector.load %arg0[%c0_3, %c128] : memref<16x256xf32, #tpu.memory_space<vmem>>, vector<16x128xf32>
    %c0_4 = arith.constant 0 : index
    %c0_5 = arith.constant 0 : index
    %4 = vector.load %arg1[%c0_4, %c0_5] : memref<128x512xf32, #tpu.memory_space<vmem>>, vector<128x512xf32>
    %c0_6 = arith.constant 0 : index
    %c0_7 = arith.constant 0 : index
    %5 = vector.load %arg2[%c0_6, %c0_7] : memref<256x176xf32, #tpu.memory_space<vmem>>, vector<256x128xf32>
    %c0_8 = arith.constant 0 : index
    %c128_9 = arith.constant 128 : index
    %6 = vector.load %arg2[%c0_8, %c128_9] : memref<256x176xf32, #tpu.memory_space<vmem>>, vector<256x32xf32>
    %c0_10 = arith.constant 0 : index
    %c160 = arith.constant 160 : index
    %7 = vector.load %arg2[%c0_10, %c160] : memref<256x176xf32, #tpu.memory_space<vmem>>, vector<192x16xf32>
    %c192 = arith.constant 192 : index
    %c160_11 = arith.constant 160 : index
    %8 = vector.load %arg2[%c192, %c160_11] : memref<256x176xf32, #tpu.memory_space<vmem>>, vector<16x16xf32>
    %c208 = arith.constant 208 : index
    %c160_12 = arith.constant 160 : index
    %9 = vector.load %arg2[%c208, %c160_12] : memref<256x176xf32, #tpu.memory_space<vmem>>, vector<16x16xf32>
    %c0_13 = arith.constant 0 : index
    %c0_14 = arith.constant 0 : index
    %10 = vector.load %arg3[%c0_13, %c0_14] : memref<56x256xf32, #tpu.memory_space<vmem>>, vector<32x96xf32>
    %c32_15 = arith.constant 32 : index
    %c0_16 = arith.constant 0 : index
    %11 = vector.load %arg3[%c32_15, %c0_16] : memref<56x256xf32, #tpu.memory_space<vmem>>, vector<16x128xf32>
    %c48 = arith.constant 48 : index
    %c0_17 = arith.constant 0 : index
    %12 = vector.load %arg3[%c48, %c0_17] : memref<56x256xf32, #tpu.memory_space<vmem>>, vector<8x256xf32>
    %13 = vector.extract_strided_slice %12 {offsets = [0, 0], sizes = [1, 96], strides = [1, 1]} : vector<8x256xf32> to vector<1x96xf32>
    %14 = vector.extract_strided_slice %12 {offsets = [1, 0], sizes = [1, 256], strides = [1, 1]} : vector<8x256xf32> to vector<1x256xf32>
    %15 = vector.extract_strided_slice %12 {offsets = [2, 0], sizes = [1, 256], strides = [1, 1]} : vector<8x256xf32> to vector<1x256xf32>
    %16 = vector.extract_strided_slice %12 {offsets = [3, 0], sizes = [1, 128], strides = [1, 1]} : vector<8x256xf32> to vector<1x128xf32>
    %17 = vector.extract_strided_slice %12 {offsets = [3, 128], sizes = [1, 16], strides = [1, 1]} : vector<8x256xf32> to vector<1x16xf32>
    %18 = vector.extract_strided_slice %12 {offsets = [3, 144], sizes = [1, 16], strides = [1, 1]} : vector<8x256xf32> to vector<1x16xf32>
    %19 = vector.extract_strided_slice %12 {offsets = [3, 160], sizes = [1, 16], strides = [1, 1]} : vector<8x256xf32> to vector<1x16xf32>
    %cst = arith.constant dense<0.000000e+00> : vector<16x96xf32>
    %20 = tpu.matmul %0, %10, %cst {dimension_numbers = #tpu.dot_dimension_numbers<[1], [0], [0], [1], [0, 0, 1, 1], [], []>} : vector<16x32xf32>, vector<32x96xf32>, vector<16x96xf32> -> vector<16x96xf32>
    %21 = vector.broadcast %13 : vector<1x96xf32> to vector<16x96xf32>
    %22 = arith.addf %20, %21 : vector<16x96xf32>
    %23 = vector.broadcast %1 : vector<16x1xf32> to vector<16x96xf32>
    %24 = arith.mulf %22, %23 : vector<16x96xf32>
    %25 = vector.extract_strided_slice %24 {offsets = [0, 0], sizes = [16, 32], strides = [1, 1]} : vector<16x96xf32> to vector<16x32xf32>
    %26 = vector.extract_strided_slice %24 {offsets = [0, 32], sizes = [16, 32], strides = [1, 1]} : vector<16x96xf32> to vector<16x32xf32>
    %27 = vector.extract_strided_slice %24 {offsets = [0, 64], sizes = [16, 32], strides = [1, 1]} : vector<16x96xf32> to vector<16x32xf32>
    %28 = tpu.concatenate %25, %25, %25, %25, %25, %25, %25, %25 in 1 : vector<16x32xf32>, vector<16x32xf32>, vector<16x32xf32>, vector<16x32xf32>, vector<16x32xf32>, vector<16x32xf32>, vector<16x32xf32>, vector<16x32xf32> -> vector<16x256xf32>
    %29 = vector.shape_cast %26 : vector<16x32xf32> to vector<2x8x32xf32>
    %30 = vector.extract_strided_slice %29 {offsets = [0, 0, 0], sizes = [2, 1, 32], strides = [1, 1, 1]} : vector<2x8x32xf32> to vector<2x1x32xf32>
    %31 = vector.shape_cast %30 : vector<2x1x32xf32> to vector<2x1x32xf32>
    %32 = vector.broadcast %31 : vector<2x1x32xf32> to vector<2x8x32xf32>
    %33 = vector.extract_strided_slice %29 {offsets = [0, 1, 0], sizes = [2, 1, 32], strides = [1, 1, 1]} : vector<2x8x32xf32> to vector<2x1x32xf32>
    %34 = vector.shape_cast %33 : vector<2x1x32xf32> to vector<2x1x32xf32>
    %35 = vector.broadcast %34 : vector<2x1x32xf32> to vector<2x8x32xf32>
    %36 = vector.extract_strided_slice %29 {offsets = [0, 2, 0], sizes = [2, 1, 32], strides = [1, 1, 1]} : vector<2x8x32xf32> to vector<2x1x32xf32>
    %37 = vector.shape_cast %36 : vector<2x1x32xf32> to vector<2x1x32xf32>
    %38 = vector.broadcast %37 : vector<2x1x32xf32> to vector<2x8x32xf32>
    %39 = vector.extract_strided_slice %29 {offsets = [0, 3, 0], sizes = [2, 1, 32], strides = [1, 1, 1]} : vector<2x8x32xf32> to vector<2x1x32xf32>
    %40 = vector.shape_cast %39 : vector<2x1x32xf32> to vector<2x1x32xf32>
    %41 = vector.broadcast %40 : vector<2x1x32xf32> to vector<2x8x32xf32>
    %42 = vector.extract_strided_slice %29 {offsets = [0, 4, 0], sizes = [2, 1, 32], strides = [1, 1, 1]} : vector<2x8x32xf32> to vector<2x1x32xf32>
    %43 = vector.shape_cast %42 : vector<2x1x32xf32> to vector<2x1x32xf32>
    %44 = vector.broadcast %43 : vector<2x1x32xf32> to vector<2x8x32xf32>
    %45 = vector.extract_strided_slice %29 {offsets = [0, 5, 0], sizes = [2, 1, 32], strides = [1, 1, 1]} : vector<2x8x32xf32> to vector<2x1x32xf32>
    %46 = vector.shape_cast %45 : vector<2x1x32xf32> to vector<2x1x32xf32>
    %47 = vector.broadcast %46 : vector<2x1x32xf32> to vector<2x8x32xf32>
    %48 = vector.extract_strided_slice %29 {offsets = [0, 6, 0], sizes = [2, 1, 32], strides = [1, 1, 1]} : vector<2x8x32xf32> to vector<2x1x32xf32>
    %49 = vector.shape_cast %48 : vector<2x1x32xf32> to vector<2x1x32xf32>
    %50 = vector.broadcast %49 : vector<2x1x32xf32> to vector<2x8x32xf32>
    %51 = vector.extract_strided_slice %29 {offsets = [0, 7, 0], sizes = [2, 1, 32], strides = [1, 1, 1]} : vector<2x8x32xf32> to vector<2x1x32xf32>
    %52 = vector.shape_cast %51 : vector<2x1x32xf32> to vector<2x1x32xf32>
    %53 = vector.broadcast %52 : vector<2x1x32xf32> to vector<2x8x32xf32>
    %54 = tpu.concatenate %32, %35, %38, %41, %44, %47, %50, %53 in 2 : vector<2x8x32xf32>, vector<2x8x32xf32>, vector<2x8x32xf32>, vector<2x8x32xf32>, vector<2x8x32xf32>, vector<2x8x32xf32>, vector<2x8x32xf32>, vector<2x8x32xf32> -> vector<2x8x256xf32>
    %55 = vector.shape_cast %54 : vector<2x8x256xf32> to vector<16x256xf32>
    %56 = vector.shape_cast %27 : vector<16x32xf32> to vector<2x8x32xf32>
    %57 = vector.extract_strided_slice %56 {offsets = [0, 0, 0], sizes = [2, 1, 32], strides = [1, 1, 1]} : vector<2x8x32xf32> to vector<2x1x32xf32>
    %58 = vector.shape_cast %57 : vector<2x1x32xf32> to vector<2x1x32xf32>
    %59 = vector.broadcast %58 : vector<2x1x32xf32> to vector<2x8x32xf32>
    %60 = vector.extract_strided_slice %56 {offsets = [0, 1, 0], sizes = [2, 1, 32], strides = [1, 1, 1]} : vector<2x8x32xf32> to vector<2x1x32xf32>
    %61 = vector.shape_cast %60 : vector<2x1x32xf32> to vector<2x1x32xf32>
    %62 = vector.broadcast %61 : vector<2x1x32xf32> to vector<2x8x32xf32>
    %63 = vector.extract_strided_slice %56 {offsets = [0, 2, 0], sizes = [2, 1, 32], strides = [1, 1, 1]} : vector<2x8x32xf32> to vector<2x1x32xf32>
    %64 = vector.shape_cast %63 : vector<2x1x32xf32> to vector<2x1x32xf32>
    %65 = vector.broadcast %64 : vector<2x1x32xf32> to vector<2x8x32xf32>
    %66 = vector.extract_strided_slice %56 {offsets = [0, 3, 0], sizes = [2, 1, 32], strides = [1, 1, 1]} : vector<2x8x32xf32> to vector<2x1x32xf32>
    %67 = vector.shape_cast %66 : vector<2x1x32xf32> to vector<2x1x32xf32>
    %68 = vector.broadcast %67 : vector<2x1x32xf32> to vector<2x8x32xf32>
    %69 = vector.extract_strided_slice %56 {offsets = [0, 4, 0], sizes = [2, 1, 32], strides = [1, 1, 1]} : vector<2x8x32xf32> to vector<2x1x32xf32>
    %70 = vector.shape_cast %69 : vector<2x1x32xf32> to vector<2x1x32xf32>
    %71 = vector.broadcast %70 : vector<2x1x32xf32> to vector<2x8x32xf32>
    %72 = vector.extract_strided_slice %56 {offsets = [0, 5, 0], sizes = [2, 1, 32], strides = [1, 1, 1]} : vector<2x8x32xf32> to vector<2x1x32xf32>
    %73 = vector.shape_cast %72 : vector<2x1x32xf32> to vector<2x1x32xf32>
    %74 = vector.broadcast %73 : vector<2x1x32xf32> to vector<2x8x32xf32>
    %75 = vector.extract_strided_slice %56 {offsets = [0, 6, 0], sizes = [2, 1, 32], strides = [1, 1, 1]} : vector<2x8x32xf32> to vector<2x1x32xf32>
    %76 = vector.shape_cast %75 : vector<2x1x32xf32> to vector<2x1x32xf32>
    %77 = vector.broadcast %76 : vector<2x1x32xf32> to vector<2x8x32xf32>
    %78 = vector.extract_strided_slice %56 {offsets = [0, 7, 0], sizes = [2, 1, 32], strides = [1, 1, 1]} : vector<2x8x32xf32> to vector<2x1x32xf32>
    %79 = vector.shape_cast %78 : vector<2x1x32xf32> to vector<2x1x32xf32>
    %80 = vector.broadcast %79 : vector<2x1x32xf32> to vector<2x8x32xf32>
    %81 = tpu.concatenate %59, %62, %65, %68, %71, %74, %77, %80 in 2 : vector<2x8x32xf32>, vector<2x8x32xf32>, vector<2x8x32xf32>, vector<2x8x32xf32>, vector<2x8x32xf32>, vector<2x8x32xf32>, vector<2x8x32xf32>, vector<2x8x32xf32> -> vector<2x8x256xf32>
    %82 = vector.shape_cast %81 : vector<2x8x256xf32> to vector<16x256xf32>
    %83 = vector.shape_cast %1 : vector<16x1xf32> to vector<2x8x1xf32>
    %84 = vector.extract_strided_slice %83 {offsets = [0, 0, 0], sizes = [2, 1, 1], strides = [1, 1, 1]} : vector<2x8x1xf32> to vector<2x1x1xf32>
    %85 = vector.shape_cast %84 : vector<2x1x1xf32> to vector<2x1x1xf32>
    %86 = vector.broadcast %85 : vector<2x1x1xf32> to vector<2x8x32xf32>
    %87 = vector.extract_strided_slice %83 {offsets = [0, 1, 0], sizes = [2, 1, 1], strides = [1, 1, 1]} : vector<2x8x1xf32> to vector<2x1x1xf32>
    %88 = vector.shape_cast %87 : vector<2x1x1xf32> to vector<2x1x1xf32>
    %89 = vector.broadcast %88 : vector<2x1x1xf32> to vector<2x8x32xf32>
    %90 = vector.extract_strided_slice %83 {offsets = [0, 2, 0], sizes = [2, 1, 1], strides = [1, 1, 1]} : vector<2x8x1xf32> to vector<2x1x1xf32>
    %91 = vector.shape_cast %90 : vector<2x1x1xf32> to vector<2x1x1xf32>
    %92 = vector.broadcast %91 : vector<2x1x1xf32> to vector<2x8x32xf32>
    %93 = vector.extract_strided_slice %83 {offsets = [0, 3, 0], sizes = [2, 1, 1], strides = [1, 1, 1]} : vector<2x8x1xf32> to vector<2x1x1xf32>
    %94 = vector.shape_cast %93 : vector<2x1x1xf32> to vector<2x1x1xf32>
    %95 = vector.broadcast %94 : vector<2x1x1xf32> to vector<2x8x32xf32>
    %96 = vector.extract_strided_slice %83 {offsets = [0, 4, 0], sizes = [2, 1, 1], strides = [1, 1, 1]} : vector<2x8x1xf32> to vector<2x1x1xf32>
    %97 = vector.shape_cast %96 : vector<2x1x1xf32> to vector<2x1x1xf32>
    %98 = vector.broadcast %97 : vector<2x1x1xf32> to vector<2x8x32xf32>
    %99 = vector.extract_strided_slice %83 {offsets = [0, 5, 0], sizes = [2, 1, 1], strides = [1, 1, 1]} : vector<2x8x1xf32> to vector<2x1x1xf32>
    %100 = vector.shape_cast %99 : vector<2x1x1xf32> to vector<2x1x1xf32>
    %101 = vector.broadcast %100 : vector<2x1x1xf32> to vector<2x8x32xf32>
    %102 = vector.extract_strided_slice %83 {offsets = [0, 6, 0], sizes = [2, 1, 1], strides = [1, 1, 1]} : vector<2x8x1xf32> to vector<2x1x1xf32>
    %103 = vector.shape_cast %102 : vector<2x1x1xf32> to vector<2x1x1xf32>
    %104 = vector.broadcast %103 : vector<2x1x1xf32> to vector<2x8x32xf32>
    %105 = vector.extract_strided_slice %83 {offsets = [0, 7, 0], sizes = [2, 1, 1], strides = [1, 1, 1]} : vector<2x8x1xf32> to vector<2x1x1xf32>
    %106 = vector.shape_cast %105 : vector<2x1x1xf32> to vector<2x1x1xf32>
    %107 = vector.broadcast %106 : vector<2x1x1xf32> to vector<2x8x32xf32>
    %108 = tpu.concatenate %86, %89, %92, %95, %98, %101, %104, %107 in 2 : vector<2x8x32xf32>, vector<2x8x32xf32>, vector<2x8x32xf32>, vector<2x8x32xf32>, vector<2x8x32xf32>, vector<2x8x32xf32>, vector<2x8x32xf32>, vector<2x8x32xf32> -> vector<2x8x256xf32>
    %109 = vector.shape_cast %108 : vector<2x8x256xf32> to vector<16x256xf32>
    %110 = vector.shape_cast %1 : vector<16x1xf32> to vector<2x8x1xf32>
    %111 = vector.extract_strided_slice %110 {offsets = [0, 0, 0], sizes = [2, 1, 1], strides = [1, 1, 1]} : vector<2x8x1xf32> to vector<2x1x1xf32>
    %112 = vector.shape_cast %111 : vector<2x1x1xf32> to vector<2x1x1xf32>
    %113 = vector.broadcast %112 : vector<2x1x1xf32> to vector<2x8x16xf32>
    %114 = vector.extract_strided_slice %110 {offsets = [0, 1, 0], sizes = [2, 1, 1], strides = [1, 1, 1]} : vector<2x8x1xf32> to vector<2x1x1xf32>
    %115 = vector.shape_cast %114 : vector<2x1x1xf32> to vector<2x1x1xf32>
    %116 = vector.broadcast %115 : vector<2x1x1xf32> to vector<2x8x16xf32>
    %117 = vector.extract_strided_slice %110 {offsets = [0, 2, 0], sizes = [2, 1, 1], strides = [1, 1, 1]} : vector<2x8x1xf32> to vector<2x1x1xf32>
    %118 = vector.shape_cast %117 : vector<2x1x1xf32> to vector<2x1x1xf32>
    %119 = vector.broadcast %118 : vector<2x1x1xf32> to vector<2x8x16xf32>
    %120 = vector.extract_strided_slice %110 {offsets = [0, 3, 0], sizes = [2, 1, 1], strides = [1, 1, 1]} : vector<2x8x1xf32> to vector<2x1x1xf32>
    %121 = vector.shape_cast %120 : vector<2x1x1xf32> to vector<2x1x1xf32>
    %122 = vector.broadcast %121 : vector<2x1x1xf32> to vector<2x8x16xf32>
    %123 = vector.extract_strided_slice %110 {offsets = [0, 4, 0], sizes = [2, 1, 1], strides = [1, 1, 1]} : vector<2x8x1xf32> to vector<2x1x1xf32>
    %124 = vector.shape_cast %123 : vector<2x1x1xf32> to vector<2x1x1xf32>
    %125 = vector.broadcast %124 : vector<2x1x1xf32> to vector<2x8x16xf32>
    %126 = vector.extract_strided_slice %110 {offsets = [0, 5, 0], sizes = [2, 1, 1], strides = [1, 1, 1]} : vector<2x8x1xf32> to vector<2x1x1xf32>
    %127 = vector.shape_cast %126 : vector<2x1x1xf32> to vector<2x1x1xf32>
    %128 = vector.broadcast %127 : vector<2x1x1xf32> to vector<2x8x16xf32>
    %129 = vector.extract_strided_slice %110 {offsets = [0, 6, 0], sizes = [2, 1, 1], strides = [1, 1, 1]} : vector<2x8x1xf32> to vector<2x1x1xf32>
    %130 = vector.shape_cast %129 : vector<2x1x1xf32> to vector<2x1x1xf32>
    %131 = vector.broadcast %130 : vector<2x1x1xf32> to vector<2x8x16xf32>
    %132 = vector.extract_strided_slice %110 {offsets = [0, 7, 0], sizes = [2, 1, 1], strides = [1, 1, 1]} : vector<2x8x1xf32> to vector<2x1x1xf32>
    %133 = vector.shape_cast %132 : vector<2x1x1xf32> to vector<2x1x1xf32>
    %134 = vector.broadcast %133 : vector<2x1x1xf32> to vector<2x8x16xf32>
    %135 = tpu.concatenate %113, %116, %119, %122, %125, %128, %131, %134 in 2 : vector<2x8x16xf32>, vector<2x8x16xf32>, vector<2x8x16xf32>, vector<2x8x16xf32>, vector<2x8x16xf32>, vector<2x8x16xf32>, vector<2x8x16xf32>, vector<2x8x16xf32> -> vector<2x8x128xf32>
    %136 = vector.shape_cast %135 : vector<2x8x128xf32> to vector<16x128xf32>
    %137 = vector.broadcast %1 : vector<16x1xf32> to vector<16x256xf32>
    %138 = arith.mulf %137, %109 : vector<16x256xf32>
    %cst_18 = arith.constant dense<0.000000e+00> : vector<16x512xf32>
    %139 = tpu.matmul %3, %4, %cst_18 {dimension_numbers = #tpu.dot_dimension_numbers<[1], [0], [0], [1], [0, 0, 1, 1], [], []>} : vector<16x128xf32>, vector<128x512xf32>, vector<16x512xf32> -> vector<16x512xf32>
    %140 = vector.extract_strided_slice %139 {offsets = [0, 0], sizes = [16, 256], strides = [1, 1]} : vector<16x512xf32> to vector<16x256xf32>
    %141 = vector.broadcast %14 : vector<1x256xf32> to vector<16x256xf32>
    %142 = arith.addf %140, %141 : vector<16x256xf32>
    %143 = arith.mulf %142, %138 : vector<16x256xf32>
    %144 = vector.extract_strided_slice %139 {offsets = [0, 256], sizes = [16, 256], strides = [1, 1]} : vector<16x512xf32> to vector<16x256xf32>
    %145 = vector.broadcast %15 : vector<1x256xf32> to vector<16x256xf32>
    %146 = arith.addf %144, %145 : vector<16x256xf32>
    %147 = arith.mulf %146, %138 : vector<16x256xf32>
    %148 = arith.mulf %28, %55 : vector<16x256xf32>
    %cst_19 = arith.constant 0.353553385 : f32
    %149 = vector.broadcast %cst_19 : f32 to vector<16x256xf32>
    %150 = arith.mulf %148, %149 : vector<16x256xf32>
    %cst_20 = arith.constant 1.000000e+00 : f32
    %151 = vector.broadcast %cst_20 : f32 to vector<16x256xf32>
    %152 = arith.addf %143, %151 : vector<16x256xf32>
    %153 = arith.mulf %150, %152 : vector<16x256xf32>
    %154 = arith.addf %153, %147 : vector<16x256xf32>
    %cst_21 = arith.constant dense<0.000000e+00> : vector<16x128xf32>
    %155 = tpu.matmul %2, %11, %cst_21 {dimension_numbers = #tpu.dot_dimension_numbers<[1], [0], [0], [1], [0, 0, 1, 1], [], []>} : vector<16x16xf32>, vector<16x128xf32>, vector<16x128xf32> -> vector<16x128xf32>
    %156 = vector.broadcast %16 : vector<1x128xf32> to vector<16x128xf32>
    %157 = arith.addf %155, %156 : vector<16x128xf32>
    %158 = vector.extract_strided_slice %157 {offsets = [0, 0], sizes = [16, 32], strides = [1, 1]} : vector<16x128xf32> to vector<16x32xf32>
    %159 = vector.extract_strided_slice %157 {offsets = [0, 32], sizes = [16, 32], strides = [1, 1]} : vector<16x128xf32> to vector<16x32xf32>
    %160 = vector.extract_strided_slice %157 {offsets = [0, 64], sizes = [16, 16], strides = [1, 1]} : vector<16x128xf32> to vector<16x16xf32>
    %161 = vector.extract_strided_slice %157 {offsets = [0, 80], sizes = [16, 16], strides = [1, 1]} : vector<16x128xf32> to vector<16x16xf32>
    %162 = vector.extract_strided_slice %157 {offsets = [0, 96], sizes = [16, 32], strides = [1, 1]} : vector<16x128xf32> to vector<16x32xf32>
    %163 = tpu.concatenate %158, %158, %158, %158, %158, %158, %158, %158 in 1 : vector<16x32xf32>, vector<16x32xf32>, vector<16x32xf32>, vector<16x32xf32>, vector<16x32xf32>, vector<16x32xf32>, vector<16x32xf32>, vector<16x32xf32> -> vector<16x256xf32>
    %164 = tpu.concatenate %159, %159, %159, %159, %159, %159, %159, %159 in 1 : vector<16x32xf32>, vector<16x32xf32>, vector<16x32xf32>, vector<16x32xf32>, vector<16x32xf32>, vector<16x32xf32>, vector<16x32xf32>, vector<16x32xf32> -> vector<16x256xf32>
    %165 = tpu.concatenate %161, %161, %161, %161, %161, %161, %161, %161 in 1 : vector<16x16xf32>, vector<16x16xf32>, vector<16x16xf32>, vector<16x16xf32>, vector<16x16xf32>, vector<16x16xf32>, vector<16x16xf32>, vector<16x16xf32> -> vector<16x128xf32>
    %cst_22 = arith.constant 1.000000e+00 : f32
    %166 = vector.broadcast %cst_22 : f32 to vector<16x256xf32>
    %167 = arith.addf %163, %166 : vector<16x256xf32>
    %168 = arith.mulf %167, %154 : vector<16x256xf32>
    %cst_23 = arith.constant dense<0.000000e+00> : vector<16x128xf32>
    %169 = tpu.matmul %168, %5, %cst_23 {dimension_numbers = #tpu.dot_dimension_numbers<[1], [0], [0], [1], [0, 0, 1, 1], [], []>} : vector<16x256xf32>, vector<256x128xf32>, vector<16x128xf32> -> vector<16x128xf32>
    %170 = arith.addf %169, %165 : vector<16x128xf32>
    %171 = vector.broadcast %1 : vector<16x1xf32> to vector<16x128xf32>
    %172 = arith.mulf %171, %136 : vector<16x128xf32>
    %173 = arith.mulf %170, %172 : vector<16x128xf32>
    %cst_24 = arith.constant 0.000000e+00 : f32
    %174 = vector.broadcast %cst_24 : f32 to vector<16x256xf32>
    %175 = arith.cmpf ogt, %109, %174 : vector<16x256xf32>
    %cst_25 = arith.constant -1.000000e+30 : f32
    %176 = vector.broadcast %cst_25 : f32 to vector<16x256xf32>
    %177 = arith.select %175, %154, %176 : vector<16x256xi1>, vector<16x256xf32>
    %c32_i32 = arith.constant 32 : i32
    %178 = tpu.dynamic_rotate %177 by %c32_i32 dim 1 : vector<16x256xf32>, i32 -> vector<16x256xf32>
    %179 = arith.maximumf %177, %178 : vector<16x256xf32>
    %c64_i32 = arith.constant 64 : i32
    %180 = tpu.dynamic_rotate %179 by %c64_i32 dim 1 : vector<16x256xf32>, i32 -> vector<16x256xf32>
    %181 = arith.maximumf %179, %180 : vector<16x256xf32>
    %c128_i32 = arith.constant 128 : i32
    %182 = tpu.dynamic_rotate %181 by %c128_i32 dim 1 : vector<16x256xf32>, i32 -> vector<16x256xf32>
    %183 = arith.maximumf %181, %182 : vector<16x256xf32>
    %184 = arith.subf %177, %183 : vector<16x256xf32>
    %185 = math.exp %184 : vector<16x256xf32>
    %c32_i32_26 = arith.constant 32 : i32
    %186 = tpu.dynamic_rotate %185 by %c32_i32_26 dim 1 : vector<16x256xf32>, i32 -> vector<16x256xf32>
    %187 = arith.addf %185, %186 : vector<16x256xf32>
    %c64_i32_27 = arith.constant 64 : i32
    %188 = tpu.dynamic_rotate %187 by %c64_i32_27 dim 1 : vector<16x256xf32>, i32 -> vector<16x256xf32>
    %189 = arith.addf %187, %188 : vector<16x256xf32>
    %c128_i32_28 = arith.constant 128 : i32
    %190 = tpu.dynamic_rotate %189 by %c128_i32_28 dim 1 : vector<16x256xf32>, i32 -> vector<16x256xf32>
    %191 = arith.addf %189, %190 : vector<16x256xf32>
    %192 = tpu.reciprocal %191 : vector<16x256xf32> -> vector<16x256xf32>
    %193 = arith.mulf %185, %192 : vector<16x256xf32>
    %194 = arith.mulf %193, %82 : vector<16x256xf32>
    %cst_29 = arith.constant 1.000000e+00 : f32
    %195 = vector.broadcast %cst_29 : f32 to vector<16x256xf32>
    %196 = arith.addf %164, %195 : vector<16x256xf32>
    %197 = arith.mulf %194, %196 : vector<16x256xf32>
    %cst_30 = arith.constant dense<0.000000e+00> : vector<16x32xf32>
    %198 = tpu.matmul %197, %6, %cst_30 {dimension_numbers = #tpu.dot_dimension_numbers<[1], [0], [0], [1], [0, 0, 1, 1], [], []>} : vector<16x256xf32>, vector<256x32xf32>, vector<16x32xf32> -> vector<16x32xf32>
    %199 = arith.addf %198, %162 : vector<16x32xf32>
    %200 = vector.broadcast %1 : vector<16x1xf32> to vector<16x32xf32>
    %201 = arith.mulf %199, %200 : vector<16x32xf32>
    %202 = vector.shape_cast %0 : vector<16x32xf32> to vector<2x8x32xf32>
    %cst_31 = arith.constant dense<0.000000e+00> : vector<2x32xf32>
    %203 = vector.multi_reduction <add>, %202, %cst_31 [1] : vector<2x8x32xf32> to vector<2x32xf32>
    %cst_32 = arith.constant 8.000000e+00 : f32
    %204 = vector.broadcast %cst_32 : f32 to vector<2x32xf32>
    %205 = arith.divf %203, %204 : vector<2x32xf32>
    %cst_33 = arith.constant dense<0x7F800000> : vector<2x32xf32>
    %206 = vector.multi_reduction <minimumf>, %202, %cst_33 [1] : vector<2x8x32xf32> to vector<2x32xf32>
    %cst_34 = arith.constant dense<0xFF800000> : vector<2x32xf32>
    %207 = vector.multi_reduction <maximumf>, %202, %cst_34 [1] : vector<2x8x32xf32> to vector<2x32xf32>
    %208 = vector.shape_cast %205 : vector<2x32xf32> to vector<2x1x32xf32>
    %209 = vector.broadcast %208 : vector<2x1x32xf32> to vector<2x8x32xf32>
    %210 = arith.subf %202, %209 : vector<2x8x32xf32>
    %211 = arith.mulf %210, %210 : vector<2x8x32xf32>
    %cst_35 = arith.constant dense<0.000000e+00> : vector<2x32xf32>
    %212 = vector.multi_reduction <add>, %211, %cst_35 [1] : vector<2x8x32xf32> to vector<2x32xf32>
    %cst_36 = arith.constant 7.000000e+00 : f32
    %213 = vector.broadcast %cst_36 : f32 to vector<2x32xf32>
    %214 = arith.divf %212, %213 : vector<2x32xf32>
    %215 = math.sqrt %214 : vector<2x32xf32>
    %216 = vector.shape_cast %3 : vector<16x128xf32> to vector<2x8x128xf32>
    %cst_37 = arith.constant dense<0.000000e+00> : vector<2x128xf32>
    %217 = vector.multi_reduction <add>, %216, %cst_37 [1] : vector<2x8x128xf32> to vector<2x128xf32>
    %c16_i32 = arith.constant 16 : i32
    %218 = tpu.dynamic_rotate %217 by %c16_i32 dim 1 : vector<2x128xf32>, i32 -> vector<2x128xf32>
    %219 = arith.addf %217, %218 : vector<2x128xf32>
    %c32_i32_38 = arith.constant 32 : i32
    %220 = tpu.dynamic_rotate %219 by %c32_i32_38 dim 1 : vector<2x128xf32>, i32 -> vector<2x128xf32>
    %221 = arith.addf %219, %220 : vector<2x128xf32>
    %c64_i32_39 = arith.constant 64 : i32
    %222 = tpu.dynamic_rotate %221 by %c64_i32_39 dim 1 : vector<2x128xf32>, i32 -> vector<2x128xf32>
    %223 = arith.addf %221, %222 : vector<2x128xf32>
    %cst_40 = arith.constant 1.562500e-02 : f32
    %224 = vector.broadcast %cst_40 : f32 to vector<2x128xf32>
    %225 = arith.mulf %223, %224 : vector<2x128xf32>
    %cst_41 = arith.constant dense<0x7F800000> : vector<2x128xf32>
    %226 = vector.multi_reduction <minimumf>, %216, %cst_41 [1] : vector<2x8x128xf32> to vector<2x128xf32>
    %c16_i32_42 = arith.constant 16 : i32
    %227 = tpu.dynamic_rotate %226 by %c16_i32_42 dim 1 : vector<2x128xf32>, i32 -> vector<2x128xf32>
    %228 = arith.minimumf %226, %227 : vector<2x128xf32>
    %c32_i32_43 = arith.constant 32 : i32
    %229 = tpu.dynamic_rotate %228 by %c32_i32_43 dim 1 : vector<2x128xf32>, i32 -> vector<2x128xf32>
    %230 = arith.minimumf %228, %229 : vector<2x128xf32>
    %c64_i32_44 = arith.constant 64 : i32
    %231 = tpu.dynamic_rotate %230 by %c64_i32_44 dim 1 : vector<2x128xf32>, i32 -> vector<2x128xf32>
    %232 = arith.minimumf %230, %231 : vector<2x128xf32>
    %cst_45 = arith.constant dense<0xFF800000> : vector<2x128xf32>
    %233 = vector.multi_reduction <maximumf>, %216, %cst_45 [1] : vector<2x8x128xf32> to vector<2x128xf32>
    %c16_i32_46 = arith.constant 16 : i32
    %234 = tpu.dynamic_rotate %233 by %c16_i32_46 dim 1 : vector<2x128xf32>, i32 -> vector<2x128xf32>
    %235 = arith.maximumf %233, %234 : vector<2x128xf32>
    %c32_i32_47 = arith.constant 32 : i32
    %236 = tpu.dynamic_rotate %235 by %c32_i32_47 dim 1 : vector<2x128xf32>, i32 -> vector<2x128xf32>
    %237 = arith.maximumf %235, %236 : vector<2x128xf32>
    %c64_i32_48 = arith.constant 64 : i32
    %238 = tpu.dynamic_rotate %237 by %c64_i32_48 dim 1 : vector<2x128xf32>, i32 -> vector<2x128xf32>
    %239 = arith.maximumf %237, %238 : vector<2x128xf32>
    %240 = vector.shape_cast %225 : vector<2x128xf32> to vector<2x1x128xf32>
    %241 = vector.broadcast %240 : vector<2x1x128xf32> to vector<2x8x128xf32>
    %242 = arith.subf %216, %241 : vector<2x8x128xf32>
    %243 = arith.mulf %242, %242 : vector<2x8x128xf32>
    %cst_49 = arith.constant dense<0.000000e+00> : vector<2x128xf32>
    %244 = vector.multi_reduction <add>, %243, %cst_49 [1] : vector<2x8x128xf32> to vector<2x128xf32>
    %c16_i32_50 = arith.constant 16 : i32
    %245 = tpu.dynamic_rotate %244 by %c16_i32_50 dim 1 : vector<2x128xf32>, i32 -> vector<2x128xf32>
    %246 = arith.addf %244, %245 : vector<2x128xf32>
    %c32_i32_51 = arith.constant 32 : i32
    %247 = tpu.dynamic_rotate %246 by %c32_i32_51 dim 1 : vector<2x128xf32>, i32 -> vector<2x128xf32>
    %248 = arith.addf %246, %247 : vector<2x128xf32>
    %c64_i32_52 = arith.constant 64 : i32
    %249 = tpu.dynamic_rotate %248 by %c64_i32_52 dim 1 : vector<2x128xf32>, i32 -> vector<2x128xf32>
    %250 = arith.addf %248, %249 : vector<2x128xf32>
    %cst_53 = arith.constant 0.0158730168 : f32
    %251 = vector.broadcast %cst_53 : f32 to vector<2x128xf32>
    %252 = arith.mulf %250, %251 : vector<2x128xf32>
    %253 = math.sqrt %252 : vector<2x128xf32>
    %254 = vector.extract_strided_slice %225 {offsets = [0, 0], sizes = [2, 16], strides = [1, 1]} : vector<2x128xf32> to vector<2x16xf32>
    %255 = vector.extract_strided_slice %232 {offsets = [0, 0], sizes = [2, 16], strides = [1, 1]} : vector<2x128xf32> to vector<2x16xf32>
    %256 = vector.extract_strided_slice %239 {offsets = [0, 0], sizes = [2, 16], strides = [1, 1]} : vector<2x128xf32> to vector<2x16xf32>
    %257 = vector.extract_strided_slice %253 {offsets = [0, 0], sizes = [2, 16], strides = [1, 1]} : vector<2x128xf32> to vector<2x16xf32>
    %258 = tpu.concatenate %205, %206, %207, %215, %254, %255, %256, %257 in 1 : vector<2x32xf32>, vector<2x32xf32>, vector<2x32xf32>, vector<2x32xf32>, vector<2x16xf32>, vector<2x16xf32>, vector<2x16xf32>, vector<2x16xf32> -> vector<2x192xf32>
    %259 = vector.shape_cast %258 : vector<2x192xf32> to vector<2x1x192xf32>
    %260 = vector.shape_cast %259 : vector<2x1x192xf32> to vector<2x1x192xf32>
    %261 = vector.broadcast %260 : vector<2x1x192xf32> to vector<2x8x192xf32>
    %262 = vector.shape_cast %261 : vector<2x8x192xf32> to vector<16x192xf32>
    %cst_54 = arith.constant dense<0.000000e+00> : vector<16x16xf32>
    %263 = tpu.matmul %262, %7, %cst_54 {dimension_numbers = #tpu.dot_dimension_numbers<[1], [0], [0], [1], [0, 0, 1, 1], [], []>} : vector<16x192xf32>, vector<192x16xf32>, vector<16x16xf32> -> vector<16x16xf32>
    %264 = arith.addf %160, %263 : vector<16x16xf32>
    %265 = vector.broadcast %17 : vector<1x16xf32> to vector<16x16xf32>
    %266 = arith.addf %264, %265 : vector<16x16xf32>
    %cst_55 = arith.constant dense<0.000000e+00> : vector<16x16xf32>
    %267 = tpu.matmul %266, %8, %cst_55 {dimension_numbers = #tpu.dot_dimension_numbers<[1], [0], [0], [1], [0, 0, 1, 1], [], []>} : vector<16x16xf32>, vector<16x16xf32>, vector<16x16xf32> -> vector<16x16xf32>
    %268 = vector.broadcast %18 : vector<1x16xf32> to vector<16x16xf32>
    %269 = arith.addf %267, %268 : vector<16x16xf32>
    %cst_56 = arith.constant 0.000000e+00 : f32
    %270 = vector.broadcast %cst_56 : f32 to vector<16x16xf32>
    %271 = arith.maximumf %269, %270 : vector<16x16xf32>
    %cst_57 = arith.constant dense<0.000000e+00> : vector<16x16xf32>
    %272 = tpu.matmul %271, %9, %cst_57 {dimension_numbers = #tpu.dot_dimension_numbers<[1], [0], [0], [1], [0, 0, 1, 1], [], []>} : vector<16x16xf32>, vector<16x16xf32>, vector<16x16xf32> -> vector<16x16xf32>
    %273 = vector.broadcast %19 : vector<1x16xf32> to vector<16x16xf32>
    %274 = arith.addf %272, %273 : vector<16x16xf32>
    %cst_58 = arith.constant 0.000000e+00 : f32
    %275 = vector.broadcast %cst_58 : f32 to vector<16x80xf32>
    %276 = tpu.concatenate %173, %201, %274, %275 in 1 : vector<16x128xf32>, vector<16x32xf32>, vector<16x16xf32>, vector<16x80xf32> -> vector<16x256xf32>
    %c0_59 = arith.constant 0 : index
    %c0_60 = arith.constant 0 : index
    %277 = vector.load %arg4[%c0_59, %c0_60] : memref<16x256xf32, #tpu.memory_space<vmem>>, vector<16x256xf32>
    tpu.vector_store %arg4[%c0_59, %c0_60], %276 {strides = array<i32>} : memref<16x256xf32, #tpu.memory_space<vmem>>, vector<16x256xf32>,
    return
  }
}

</mosaic_0001>

<bundles_post_ra>
// kernel: node_edge_block.1
= control target key start
LH: loop header
LB: loop body
LE: loop exit
PB: predicated region body
PF: predicated region fallthrough
CT: control target
= control target key end

     0   :  { %vm1312_vm0 = vcmask 1041409   ;;  %s2488_s19 = smov 16   ;;  %s2489_s22 = smov 64   ;;  %vm161_vm1 = vcmask 261120   ;;  %vm563_vm2 = vcmask 130048   ;;  %vm568_vm3 = vcmask 392192   ;;  %s4007_s0 = inlined_call_operand.vmem [shape: f32[16,256], index: 0, kind: input, shape index: {}]   ;;  %s4008_s3 = inlined_call_operand.vmem [shape: f32[56,256], index: 3, kind: input, shape index: {}]   ;;  %s4009_s1 = inlined_call_operand.vmem [shape: f32[128,512], index: 1, kind: input, shape index: {}]   ;;  %s4010_s2 = inlined_call_operand.vmem [shape: f32[256,176], index: 2, kind: input, shape index: {}]   ;;  %s4011_s4 = inlined_call_operand.vmem [shape: f32[16,256], index: 4, kind: output, shape index: {}]  }
   0x1   :  { %v2527_v0 = vld [vmem:[%s4007_s0 + $0x8] sm:$0xff]  ;;  %v2532_v1 = vld [vmem:[%s4007_s0 + $0x18] sm:$0xff]  ;;  %v2549_v15 = vld [vmem:[%s4007_s0] sm:$0xff]  ;;  %s2490_s5 = smov 32   ;;  %vm275_vm4 = vcmask 523264   ;;  %vm573_vm5 = vcmask 654336  }
   0x2   :  { %v2535_v2 = vrot.slane %v2527_v0, 4  ;;  %v2538_v3 = vrot.slane %v2532_v1, 4  ;;  %795 = vrot.lane.b32.xlu1 %v2549_v15, %s2489_s22  ;;  %v2556_v16 = vld [vmem:[%s4007_s0 + $0x10] sm:$0xff]  ;;  %v149_v23 = vld [vmem:[%s4008_s3] sm:$0xff]  ;;  %2143 = vmatprep.mubr.msk.f32.mxu1 %vm161_vm1, %v2549_v15  ;;  %v22_v29 = vld [vmem:[%s4009_s1 + $0x8] sm:$0xff]  ;;  %vm278_vm6 = vcmask 785408  }
   0x3   :  { %v150_v24 = vld [vmem:[%s4008_s3 + $0x10] sm:$0xff]  ;;  %v151_v25 = vld [vmem:[%s4008_s3 + $0x20] sm:$0xff]  ;;  %v26_v30 = vld [vmem:[%s4009_s1 + $0x28] sm:$0xff]  ;;  %vm578_vm7 = vcmask 916480   ;;  %s2495_s27 = smov 48   ;;  %s2498_s24 = smov 80  }
   0x4   :  { %v1299_v4 = vadd.f32 %v2535_v2, %v2527_v0  ;;  %v1305_v5 = vadd.f32 %v2538_v3, %v2532_v1  ;;  %v2167_v26 = vpack.c.bf16 %v150_v24, %v149_v23  ;;  %v152_v27 = vld [vmem:[%s4008_s3 + $0x30] sm:$0xff]  ;;  %v2175_v31 = vpack.c.bf16 %v26_v30, %v22_v29  ;;  %v21_v32 = vld [vmem:[%s4009_s1] sm:$0xff]  ;;  %v30_v34 = vld [vmem:[%s4009_s1 + $0x48] sm:$0xff] }
   0x5   :  { %v2171_v28 = vpack.c.bf16 %v152_v27, %v151_v25  ;;  %v25_v33 = vld [vmem:[%s4009_s1 + $0x20] sm:$0xff]  ;;  %v34_v35 = vld [vmem:[%s4009_s1 + $0x68] sm:$0xff]  ;;  %v2491_v25 = vmov 0.0   ;;  %v154_v29 = vld [vmem:[%s4008_s3 + $0x50] sm:$0xff] }
   0x6   :  { %v1300_v6 = vrot.slane %v1299_v4, 2  ;;  %v1306_v7 = vrot.slane %v1305_v5, 2  ;;  %797 = vrot.lane.b32.xlu1 %v2556_v16, %s2489_s22  ;;  %2168 = vmatprep.subr.bf16.mxu1 %v2167_v26  ;;  %v2177_v36 = vpack.c.bf16 %v25_v33, %v21_v32  ;;  %v2179_v37 = vpack.c.bf16 %v34_v35, %v30_v34  ;;  %v29_v38 = vld [vmem:[%s4009_s1 + $0x40] sm:$0xff]  ;;  %v38_v40 = vld [vmem:[%s4009_s1 + $0x88] sm:$0xff] }
   0x7   :  { %2170 = vmatpush3.bf16.msra.mxu1 %v2167_v26  ;;  %v33_v39 = vld [vmem:[%s4009_s1 + $0x60] sm:$0xff]  ;;  %v42_v41 = vld [vmem:[%s4009_s1 + $0xa8] sm:$0xff]  ;;  %726 = vmatprep.mubr.f32.mxu0 %v2491_v25 }
   0x8   :  { %v1301_v8 = vadd.f32 %v1300_v6, %v1299_v4  ;;  %v1307_v9 = vadd.f32 %v1306_v7, %v1305_v5  ;;  %2172 = vmatprep.subr.bf16.mxu1 %v2171_v28  ;;  %v2181_v42 = vpack.c.bf16 %v33_v39, %v29_v38  ;;  %v2183_v43 = vpack.c.bf16 %v42_v41, %v38_v40  ;;  %v37_v44 = vld [vmem:[%s4009_s1 + $0x80] sm:$0xff]  ;;  %v46_v46 = vld [vmem:[%s4009_s1 + $0xc8] sm:$0xff] }
   0x9   :  { %v41_v45 = vld [vmem:[%s4009_s1 + $0xa0] sm:$0xff]  ;;  %v50_v47 = vld [vmem:[%s4009_s1 + $0xe8] sm:$0xff] }
   0xa   :  { %v1302_v10 = vrot.slane %v1301_v8, 1  ;;  %v1308_v11 = vrot.slane %v1307_v9, 1  ;;  %v2185_v48 = vpack.c.bf16 %v41_v45, %v37_v44  ;;  %v2187_v49 = vpack.c.bf16 %v50_v47, %v46_v46  ;;  %v45_v50 = vld [vmem:[%s4009_s1 + $0xc0] sm:$0xff]  ;;  %v54_v52 = vld [vmem:[%s4009_s1 + $0x108] sm:$0xff]  ;;  %v28_v44 = vld [vmem:[%s4009_s1 + $0x38] sm:$0xff] }
   0xb   :  { %2174 = vmatpush3.bf16.msra.mxu1 %v2171_v28  ;;  %v49_v51 = vld [vmem:[%s4009_s1 + $0xe0] sm:$0xff]  ;;  %v58_v53 = vld [vmem:[%s4009_s1 + $0x128] sm:$0xff]  ;;  %v23_v45 = vld [vmem:[%s4009_s1 + $0x10] sm:$0xff] }
   0xc   :  { %v1303_v12 = vadd.f32 %v1302_v10, %v1301_v8  ;;  %v1309_v13 = vadd.f32 %v1308_v11, %v1307_v9  ;;  %2176 = vmatprep.subr.bf16.mxu1 %v2175_v31  ;;  %v2189_v54 = vpack.c.bf16 %v49_v51, %v45_v50  ;;  %v2191_v55 = vpack.c.bf16 %v58_v53, %v54_v52  ;;  %v53_v56 = vld [vmem:[%s4009_s1 + $0x100] sm:$0xff]  ;;  %v62_v58 = vld [vmem:[%s4009_s1 + $0x148] sm:$0xff]  ;;  %v27_v47 = vld [vmem:[%s4009_s1 + $0x30] sm:$0xff] }
   0xd   :  { %v57_v57 = vld [vmem:[%s4009_s1 + $0x120] sm:$0xff]  ;;  %v66_v59 = vld [vmem:[%s4009_s1 + $0x168] sm:$0xff]  ;;  %v2209_v50 = vpack.c.bf16 %v27_v47, %v23_v45  ;;  %v31_v52 = vld [vmem:[%s4009_s1 + $0x50] sm:$0xff] }
   0xe   :  { %v1313_v14 = vsel %vm1312_vm0, %v1309_v13, %v1303_v12  ;;  %2144 = vmatmul.mubr.msk.f32.vlgmr.msra.gmra.mrb[0].mxu1 %vm161_vm1, %v2556_v16  ;;  %v2193_v60 = vpack.c.bf16 %v57_v57, %v53_v56  ;;  %v2195_v61 = vpack.c.bf16 %v66_v59, %v62_v58  ;;  %v61_v62 = vld [vmem:[%s4009_s1 + $0x140] sm:$0xff]  ;;  %v70_v4 = vld [vmem:[%s4009_s1 + $0x188] sm:$0xff]  ;;  %v35_v53 = vld [vmem:[%s4009_s1 + $0x70] sm:$0xff] }
   0xf   :  { %1315 = vrot.lane.b32.xlu0 %v1313_v14, %s2488_s19  ;;  %2178 = vmatpush1.bf16.msra.mxu1 %v2177_v36  ;;  %v65_v63 = vld [vmem:[%s4009_s1 + $0x160] sm:$0xff]  ;;  %v74_v5 = vld [vmem:[%s4009_s1 + $0x1a8] sm:$0xff]  ;;  %v2213_v56 = vpack.c.bf16 %v35_v53, %v31_v52  ;;  %v39_v58 = vld [vmem:[%s4009_s1 + $0x90] sm:$0xff] }
  0x10   :  { %2180 = vmatprep.subr.bf16.mxu1 %v2179_v37  ;;  %v2197_v6 = vpack.c.bf16 %v65_v63, %v61_v62  ;;  %v2199_v7 = vpack.c.bf16 %v74_v5, %v70_v4  ;;  %v69_v8 = vld [vmem:[%s4009_s1 + $0x180] sm:$0xff]  ;;  %v78_v10 = vld [vmem:[%s4009_s1 + $0x1c8] sm:$0xff]  ;;  %649 = vmatprep.mubr.f32.mxu1 %v2491_v25  ;;  %v43_v59 = vld [vmem:[%s4009_s1 + $0xb0] sm:$0xff] }
  0x11   :  { %v73_v9 = vld [vmem:[%s4009_s1 + $0x1a0] sm:$0xff]  ;;  %v82_v11 = vld [vmem:[%s4009_s1 + $0x1e8] sm:$0xff]  ;;  %v2217_v62 = vpack.c.bf16 %v43_v59, %v39_v58  ;;  %v47_v4 = vld [vmem:[%s4009_s1 + $0xd0] sm:$0xff] }
  0x12   :  { %v77_v14 = vld [vmem:[%s4009_s1 + $0x1c0] sm:$0xff]  ;;  %v51_v5 = vld [vmem:[%s4009_s1 + $0xf0] sm:$0xff] }
  0x13   :  { %2182 = vmatpush1.bf16.msra.mxu1 %v2181_v42  ;;  %v153_v28 = vld [vmem:[%s4008_s3 + $0x40] sm:$0xff] }
  0x14   :  { %2184 = vmatprep.subr.bf16.mxu1 %v2183_v43  ;;  %v2239_v30 = vpack.c.bf16 %v154_v29, %v153_v28  ;;  %v2492_v43 = vmov 32   ;;  %v75_v28 = vld [vmem:[%s4009_s1 + $0x1b0] sm:$0xff]  ;;  %v80_v29 = vld [vmem:[%s4009_s1 + $0x1d8] sm:$0xff] }
  0x15   :  { %2394 = vset.pattern.permute.xlu1 %v2492_v43  ;;  %2395 = vset.pattern.permute.xlu0 %v2492_v43 }
  0x17   :  { %2186 = vmatpush1.bf16.msra.mxu1 %v2185_v48  ;;  %v32_v48 = vld [vmem:[%s4009_s1 + $0x58] sm:$0xff] }
  0x18   :  { %2188 = vmatprep.subr.bf16.mxu1 %v2187_v49  ;;  %v36_v49 = vld [vmem:[%s4009_s1 + $0x78] sm:$0xff] }
  0x19   :  { %v2211_v51 = vpack.c.bf16 %v36_v49, %v32_v48 }
  0x1b   :  { %2190 = vmatpush1.bf16.msra.mxu1 %v2189_v54  ;;  %v40_v54 = vld [vmem:[%s4009_s1 + $0x98] sm:$0xff] }
  0x1c   :  { %2192 = vmatprep.subr.bf16.mxu1 %v2191_v55  ;;  %v44_v55 = vld [vmem:[%s4009_s1 + $0xb8] sm:$0xff] }
  0x1d   :  { %v2215_v57 = vpack.c.bf16 %v44_v55, %v40_v54 }
  0x1f   :  { %2194 = vmatpush1.bf16.msra.mxu1 %v2193_v60  ;;  %v48_v60 = vld [vmem:[%s4009_s1 + $0xd8] sm:$0xff] }
  0x20   :  { %2196 = vmatprep.subr.bf16.mxu1 %v2195_v61  ;;  %v52_v61 = vld [vmem:[%s4009_s1 + $0xf8] sm:$0xff] }
  0x21   :  { %v2219_v63 = vpack.c.bf16 %v52_v61, %v48_v60 }
  0x23   :  { %2198 = vmatpush1.bf16.msra.mxu1 %v2197_v6  ;;  %v56_v6 = vld [vmem:[%s4009_s1 + $0x118] sm:$0xff] }
  0x24   :  { %2200 = vmatprep.subr.bf16.mxu1 %v2199_v7  ;;  %v60_v7 = vld [vmem:[%s4009_s1 + $0x138] sm:$0xff] }
  0x74   :  { %v796_v31 = vpop.permute.xlu1 %795 }
  0x78   :  { %v798_v37 = vpop.permute.xlu1 %797 }
  0x81   :  { %v1316_v17 = vpop.permute.xlu0 %1315 }
  0x82   :  { %v1318_v18 = vrot.slane %v1316_v17, 1  ;;  %v2562_v20 = vadd.f32 %v1316_v17, %v1303_v12  ;;  %v2201_v12 = vpack.c.bf16 %v73_v9, %v69_v8  ;;  %v81_v17 = vld [vmem:[%s4009_s1 + $0x1e0] sm:$0xff]  ;;  %v2221_v8 = vpack.c.bf16 %v51_v5, %v47_v4 }
  0x83   :  { %v2223_v9 = vpack.c.bf16 %v60_v7, %v56_v6 }
  0x84   :  { %v2560_v19 = vadd.f32 %v1318_v18, %v1309_v13  ;;  %v2203_v13 = vpack.c.bf16 %v82_v11, %v78_v10  ;;  %2202 = vmatpush1.bf16.msra.mxu1 %v2201_v12  ;;  %v2205_v18 = vpack.c.bf16 %v81_v17, %v77_v14  ;;  %v55_v10 = vld [vmem:[%s4009_s1 + $0x110] sm:$0xff]  ;;  %v64_v12 = vld [vmem:[%s4009_s1 + $0x158] sm:$0xff] }
  0x85   :  { %v59_v11 = vld [vmem:[%s4009_s1 + $0x130] sm:$0xff] }
  0x86   :  { %v1325_v21 = vrot.slane %v2560_v19, 7  ;;  %2204 = vmatprep.subr.bf16.mxu1 %v2203_v13  ;;  %v68_v13 = vld [vmem:[%s4009_s1 + $0x178] sm:$0xff]  ;;  %v2225_v14 = vpack.c.bf16 %v59_v11, %v55_v10 }
  0x87   :  { %v2227_v17 = vpack.c.bf16 %v68_v13, %v64_v12 }
  0x88   :  { %v1326_v22 = vsel %vm1312_vm0, %v1325_v21, %v2562_v20  ;;  %2206 = vmatpush1.bf16.msra.mxu1 %v2205_v18  ;;  %v1352_v21 = vmin.f32 %v2527_v0, %v2535_v2  ;;  %v63_v18 = vld [vmem:[%s4009_s1 + $0x150] sm:$0xff] }
  0x89   :  { %1328 = vrot.lane.b32.xlu0 %v1326_v22, %s2490_s5  ;;  %v1358_v22 = vmin.f32 %v2532_v1, %v2538_v3  ;;  %2240 = vmatprep.subr.bf16.mxu1 %v2239_v30 }
  0x8a   :  { %v1353_v23 = vrot.slane %v1352_v21, 2 }
  0x8b   :  { %v1359_v24 = vrot.slane %v1358_v22, 2  ;;  %650 = vmatmul.mubr.f32.vlgmr.msra.gmra.mrb[2].mxu1 %v2527_v0 }
  0x8c   :  { %v1354_v26 = vmin.f32 %v1352_v21, %v1353_v23  ;;  %655 = vmatprep.mubr.f32.mxu1 %v2491_v25  ;;  %2242 = vmatpush3.bf16.msra.mxu1 %v2239_v30  ;;  %v67_v21 = vld [vmem:[%s4009_s1 + $0x170] sm:$0xff]  ;;  %v76_v23 = vld [vmem:[%s4009_s1 + $0x1b8] sm:$0xff] }
  0x8d   :  { %v1360_v27 = vmin.f32 %v1358_v22, %v1359_v24  ;;  %v72_v22 = vld [vmem:[%s4009_s1 + $0x198] sm:$0xff]  ;;  %v2229_v24 = vpack.c.bf16 %v67_v21, %v63_v18 }
  0x8e   :  { %v1355_v34 = vrot.slane %v1354_v26, 1  ;;  %v84_v30 = vld [vmem:[%s4009_s1 + $0x1f8] sm:$0xff] }
  0x8f   :  { %656 = vmatmul.mubr.f32.gmra.mrb[4].mxu1 %v2532_v1  ;;  %v1361_v35 = vrot.slane %v1360_v27, 1 }
  0x90   :  { %2150 = vmatprep.mubr.msk.f32.mxu1 %vm563_vm2, %v796_v31  ;;  %v2704_v40 = vmin.f32 %v1354_v26, %v1355_v34  ;;  %v2231_v26 = vpack.c.bf16 %v76_v23, %v72_v22  ;;  %v83_v34 = vld [vmem:[%s4009_s1 + $0x1f0] sm:$0xff]  ;;  %v492_v22 = vrot.slane %v2556_v16, 3  ;;  %v504_v23 = vrot.slane %v2556_v16, 4 }
  0x91   :  { %v2706_v41 = vmin.f32 %v1360_v27, %v1361_v35  ;;  %v71_v27 = vld [vmem:[%s4009_s1 + $0x190] sm:$0xff] }
  0x92   :  { %v2233_v31 = vpack.c.bf16 %v75_v28, %v71_v27 }
  0x93   :  { %2151 = vmatmul.mubr.msk.f32.vlgmr.msra.gmra.mrb[6].mxu1 %vm563_vm2, %v798_v37  ;;  %v4012_v37 = vlaneseq }
  0xe1   :  { %v2145_v27 = vpop.f32.mrb[0].mxu1 }
  0xfb   :  { %v1329_v32 = vpop.permute.xlu0 %1328 }
  0xfc   :  { %v1331_v33 = vrot.slane %v1329_v32, 1  ;;  %v2701_v38 = vadd.f32 %v1329_v32, %v2562_v20  ;;  %v24_v20 = vld [vmem:[%s4009_s1 + $0x18] sm:$0xff]  ;;  %v2235_v32 = vpack.c.bf16 %v84_v30, %v80_v29  ;;  %v2862_v29 = vpop.f32.mrb[1].mxu1  ;;  %v528_v30 = vrot.slane %v2556_v16, 6 }
  0xfd   :  { %v2207_v46 = vpack.c.bf16 %v28_v44, %v24_v20 }
  0xfe   :  { %v2696_v36 = vadd.f32 %v1331_v33, %v2560_v19  ;;  %v1365_v19 = vsel %vm1312_vm0, %v2706_v41, %v2704_v40  ;;  %v79_v33 = vld [vmem:[%s4009_s1 + $0x1d0] sm:$0xff]  ;;  %s2493_s1 = smov 96  }
  0xff   :  { %2208 = vmatprep.subr.bf16.mxu0 %v2207_v46  ;;  %v2237_v35 = vpack.c.bf16 %v83_v34, %v79_v33 }
 0x100   :  { %v1338_v39 = vrot.slane %v2696_v36, 7  ;;  %2210 = vmatpush1.bf16.msra.mxu0 %v2209_v50 }
 0x101   :  { %2212 = vmatprep.subr.bf16.mxu0 %v2211_v51  ;;  %v1408_v51 = vmax.f32 %v2532_v1, %v2538_v3 }
 0x102   :  { %v1339_v42 = vsel %vm1312_vm0, %v1338_v39, %v2701_v38  ;;  %v2815_v39 = vshrl.u32 %v4012_v37, 7 }
 0x103   :  { %1341 = vrot.lane.b32.xlu0 %v1339_v42, %s2489_s22 }
 0x104   :  { %2214 = vmatpush1.bf16.msra.mxu0 %v2213_v56  ;;  %v1409_v56 = vrot.slane %v1408_v51, 2  ;;  %v2875_v34 = vsub.s32 3, %v2815_v39 }
 0x105   :  { %2216 = vmatprep.subr.bf16.mxu0 %v2215_v57 }
 0x107   :  { %1367 = vrot.lane.b32.xlu0 %v1365_v19, %s2488_s19  ;;  %v2818_v19 = vsub.s32 0, %v2815_v39 }
 0x108   :  { %2218 = vmatpush1.bf16.msra.mxu0 %v2217_v62 }
 0x109   :  { %2220 = vmatprep.subr.bf16.mxu0 %v2219_v63 }
 0x10c   :  { %2222 = vmatpush1.bf16.msra.mxu0 %v2221_v8 }
 0x10d   :  { %2224 = vmatprep.subr.bf16.mxu0 %v2223_v9 }
 0x110   :  { %2226 = vmatpush1.bf16.msra.mxu0 %v2225_v14 }
 0x111   :  { %2228 = vmatprep.subr.bf16.mxu0 %v2227_v17 }
 0x114   :  { %2230 = vmatpush1.bf16.msra.mxu0 %v2229_v24  ;;  %v516_v24 = vrot.slane %v2556_v16, 5 }
 0x115   :  { %2232 = vmatprep.subr.bf16.mxu0 %v2231_v26  ;;  %v2856_v26 = vld [vmem:[%s4008_s3 + $0x60] sm:$0xff] }
 0x116   :  { %v2860_v28 = vrot.slane %v2856_v26, %v2818_v19 }
 0x118   :  { %2234 = vmatpush1.bf16.msra.mxu0 %v2233_v31  ;;  %v2867_v31 = vadd.f32 %v2145_v27, %v2860_v28  ;;  %v103_v27 = vld [vmem:[%s4010_s2 + $0x120] sm:$0xff] }
 0x119   :  { %2236 = vmatprep.subr.bf16.mxu0 %v2235_v32 }
 0x11c   :  { %2238 = vmatpush1.bf16.msra.mxu0 %v2237_v35 }
 0x11f   :  { %727 = vmatmul.mubr.f32.vlgmr.msra.gmra.mrb[0].mxu0 %v2527_v0 }
 0x120   :  { %732 = vmatprep.mubr.f32.mxu0 %v2491_v25  ;;  %v1402_v25 = vmax.f32 %v2527_v0, %v2535_v2 }
 0x122   :  { %v1403_v53 = vrot.slane %v1402_v25, 2 }
 0x123   :  { %733 = vmatmul.mubr.f32.gmra.mrb[2].mxu0 %v2532_v1 }
 0x124   :  { %v1404_v58 = vmax.f32 %v1402_v25, %v1403_v53 }
 0x126   :  { %v1405_v3 = vrot.slane %v1404_v58, 1 }
 0x128   :  { %v1406_v8 = vmax.f32 %v1404_v58, %v1405_v3  ;;  %v515_v3 = vrot.slane %v2549_v15, 5 }
 0x15e   :  { %v2870_v32 = vpop.f32.mrb[2].mxu1 }
 0x15f   :  { %v2872_v33 = vpop.f32.mrb[3].mxu1 }
 0x162   :  { %v2877_v35 = vpop.f32.mrb[4].mxu1 }
 0x175   :  { %v1342_v42 = vpop.permute.xlu0 %1341 }
 0x176   :  { %v1344_v43 = vrot.slane %v1342_v42, 1  ;;  %v1347_v20 = vadd.f32 %v1342_v42, %v2701_v38  ;;  %v2879_v42 = vpop.f32.mrb[5].mxu1 }
 0x178   :  { %v1348_v44 = vadd.f32 %v1344_v43, %v2696_v36  ;;  %v1349_v45 = vmul.f32 0.015625, %v1347_v20  ;;  %v2883_v43 = vrot.slane %v2856_v26, %v2875_v34  ;;  %v2152_v20 = vpop.f32.mrb[6].mxu1 }
 0x179   :  { %v1368_v61 = vpop.permute.xlu0 %1367 }
 0x17a   :  { %v1350_v46 = vmul.f32 0.015625, %v1348_v44  ;;  %v1454_v47 = vrot.slane %v1349_v45, %v2818_v19  ;;  %v1370_v4 = vrot.slane %v1368_v61, 1  ;;  %v1373_v14 = vmin.f32 %v2704_v40, %v1368_v61 }
 0x17b   :  { %v480_v40 = vrot.slane %v2556_v16, 2  ;;  %v2886_v44 = vadd.f32 %v2152_v20, %v2883_v43  ;;  %v479_v61 = vrot.slane %v2549_v15, 2  ;;  %v3009_v20 = vld [vmem:[%s4010_s2 + $0xe8] sm:$0xff] }
 0x17c   :  { %v1458_v48 = vrot.slane %v1350_v46, %v2818_v19  ;;  %v1459_v49 = vsub.f32 %v2527_v0, %v1454_v47  ;;  %v1553_v50 = vrot.slane %v1350_v46, 7  ;;  %v1410_v0 = vmax.f32 %v1408_v51, %v1409_v56  ;;  %4069 = vst [vmem:[#allocation9_spill] sm:$0xff] %v3009_v20 }
 0x17d   :  { %v1374_v9 = vmin.f32 %v2706_v41, %v1370_v4  ;;  %v468_v41 = vrot.slane %v2556_v16, 1  ;;  %v2928_v4 = vld [vmem:[%s4010_s2 + $0x28] sm:$0xff] }
 0x17e   :  { %v1460_v52 = vsub.f32 %v2532_v1, %v1458_v48  ;;  %v1461_v38 = vmul.f32 %v1459_v49, %v1459_v49  ;;  %v2831_v36 = vsel %vm1312_vm0, %v1553_v50, %v1349_v45  ;;  %v1411_v6 = vrot.slane %v1410_v0, 1  ;;  %v2888_v45 = vpop.f32.mrb[7].mxu1 }
 0x17f   :  { %v1377_v18 = vrot.slane %v1374_v9, 7 }
 0x180   :  { %v1462_v54 = vmul.f32 %v1460_v52, %v1460_v52  ;;  %v1463_v55 = vrot.slane %v1461_v38, 4  ;;  %v1412_v12 = vmax.f32 %v1410_v0, %v1411_v6  ;;  %v467_v0 = vrot.slane %v2549_v15, 1  ;;  %v2940_v6 = vld [vmem:[%s4010_s2 + $0x8] sm:$0xff] }
 0x181   :  { %v1378_v21 = vsel %vm1312_vm0, %v1377_v18, %v1373_v14  ;;  %v87_v18 = vld [vmem:[%s4010_s2 + $0x20] sm:$0xff] }
 0x182   :  { %v1464_v57 = vadd.f32 %v1463_v55, %v1461_v38  ;;  %v1469_v2 = vrot.slane %v1462_v54, 4  ;;  %v1415_v17 = vsel %vm1312_vm0, %v1412_v12, %v1406_v8 }
 0x184   :  { %v1465_v59 = vrot.slane %v1464_v57, 2  ;;  %v1470_v60 = vadd.f32 %v1469_v2, %v1462_v54 }
 0x186   :  { %v1466_v62 = vadd.f32 %v1465_v59, %v1464_v57  ;;  %v1471_v63 = vrot.slane %v1470_v60, 2 }
 0x188   :  { %v1467_v1 = vrot.slane %v1466_v62, 1  ;;  %v1472_v5 = vadd.f32 %v1471_v63, %v1470_v60  ;;  %v503_v63 = vrot.slane %v2549_v15, 4 }
 0x18a   :  { %v1473_v7 = vrot.slane %v1472_v5, 1  ;;  %v1468_v10 = vadd.f32 %v1467_v1, %v1466_v62  ;;  %v491_v62 = vrot.slane %v2549_v15, 3  ;;  %v2933_v1 = vld [vmem:[%s4010_s2 + $0x38] sm:$0xff] }
 0x18c   :  { %v1474_v11 = vadd.f32 %v1473_v7, %v1472_v5  ;;  %v2945_v7 = vld [vmem:[%s4010_s2 + $0x18] sm:$0xff] }
 0x18e   :  { %v1477_v13 = vsel %vm1312_vm0, %v1474_v11, %v1468_v10 }
 0x18f   :  { %1479 = vrot.lane.b32.xlu1 %v1477_v13, %s2488_s19  ;;  %v2966_v13 = vld [vmem:[%s4010_s2 + $0x48] sm:$0xff] }
 0x193   :  { %1417 = vrot.lane.b32.xlu1 %v1415_v17, %s2488_s19  ;;  %v539_v17 = vrot.slane %v2549_v15, 7 }
 0x197   :  { %1380 = vrot.lane.b32.xlu1 %v1378_v21, %s2490_s5  ;;  %v2980_v21 = vld [vmem:[%s4010_s2 + $0xa8] sm:$0xff] }
 0x198   :  { %4064 = vst [vmem:[#allocation4_spill] sm:$0xff] %v2980_v21 }
 0x19b   :  { %244 = vperm.xlu1 %2394, %v2549_v15  }
 0x19f   :  { %459 = vrot.lane.b32.xlu1 %v2556_v16, %s2493_s1 }
 0x1a3   :  { %471 = vrot.lane.b32.xlu1 %v468_v41, %s2493_s1  ;;  %v2985_v41 = vld [vmem:[%s4010_s2 + $0xb8] sm:$0xff] }
 0x1a4   :  { %4065 = vst [vmem:[#allocation5_spill] sm:$0xff] %v2985_v41 }
 0x1a7   :  { %483 = vrot.lane.b32.xlu1 %v480_v40, %s2493_s1 }
 0x1ab   :  { %495 = vrot.lane.b32.xlu1 %v492_v22, %s2493_s1  ;;  %v2992_v22 = vld [vmem:[%s4010_s2 + $0x88] sm:$0xff] }
 0x1ac   :  { %4066 = vst [vmem:[#allocation6_spill] sm:$0xff] %v2992_v22 }
 0x1af   :  { %507 = vrot.lane.b32.xlu1 %v504_v23, %s2493_s1  ;;  %v2997_v23 = vld [vmem:[%s4010_s2 + $0x98] sm:$0xff] }
 0x1b0   :  { %4067 = vst [vmem:[#allocation7_spill] sm:$0xff] %v2997_v23 }
 0x1b3   :  { %519 = vrot.lane.b32.xlu1 %v516_v24, %s2493_s1  ;;  %v235_v24 = vadd.f32 %v2862_v29, %v2860_v28  ;;  %v540_v28 = vrot.slane %v2556_v16, 7  ;;  %v315_v29 = vsub.s32 4, %v2815_v39 }
 0x1b7   :  { %531 = vrot.lane.b32.xlu1 %v528_v30, %s2493_s1 }
 0x201   :  { %v1480_v46 = vpop.permute.xlu1 %1479 }
 0x202   :  { %v1482_v47 = vrot.slane %v1480_v46, 1  ;;  %v2892_v49 = vadd.f32 %v1480_v46, %v1468_v10  ;;  %v2954_v10 = vld [vmem:[%s4010_s2 + $0x68] sm:$0xff]  ;;  %v3014_v46 = vld [vmem:[%s4010_s2 + $0xf8] sm:$0xff] }
 0x203   :  { %4062 = vst [vmem:[#allocation2_spill] sm:$0xff] %v2954_v10  ;;  %4070 = vst [vmem:[#allocation10_spill] sm:$0xff] %v3014_v46 }
 0x204   :  { %v2890_v25 = vadd.f32 %v1482_v47, %v1474_v11  ;;  %v2959_v11 = vld [vmem:[%s4010_s2 + $0x78] sm:$0xff] }
 0x205   :  { %v1418_v48 = vpop.permute.xlu1 %1417  ;;  %4063 = vst [vmem:[#allocation3_spill] sm:$0xff] %v2959_v11 }
 0x206   :  { %v1420_v50 = vrot.slane %v1418_v48, 1  ;;  %v1489_v51 = vrot.slane %v2890_v25, 7  ;;  %v2900_v54 = vmax.f32 %v1406_v8, %v1418_v48  ;;  %v527_v8 = vrot.slane %v2549_v15, 6 }
 0x208   :  { %v2895_v52 = vmax.f32 %v1412_v12, %v1420_v50  ;;  %v1490_v38 = vsel %vm1312_vm0, %v1489_v51, %v2892_v49  ;;  %v3027_v50 = vld [vmem:[%s4010_s2 + $0xc8] sm:$0xff]  ;;  %v3032_v51 = vld [vmem:[%s4010_s2 + $0xd8] sm:$0xff] }
 0x209   :  { %1492 = vrot.lane.b32.xlu0 %v1490_v38, %s2490_s5  ;;  %v1381_v53 = vpop.permute.xlu1 %1380  ;;  %4071 = vst [vmem:[#allocation11_spill] sm:$0xff] %v3027_v50  ;;  %4072 = vst [vmem:[#allocation12_spill] sm:$0xff] %v3032_v51 }
 0x20a   :  { %v1383_v55 = vrot.slane %v1381_v53, 1  ;;  %v1427_v56 = vrot.slane %v2895_v52, 7  ;;  %v2908_v58 = vmin.f32 %v1373_v14, %v1381_v53  ;;  %v2971_v14 = vld [vmem:[%s4010_s2 + $0x58] sm:$0xff] }
 0x20c   :  { %v2903_v57 = vmin.f32 %v1374_v9, %v1383_v55  ;;  %v1428_v2 = vsel %vm1312_vm0, %v1427_v56, %v2900_v54  ;;  %v4015_v56 = vsub.s32 7, %v2815_v39 }
 0x20d   :  { %1430 = vrot.lane.b32.xlu0 %v1428_v2, %s2490_s5 }
 0x20e   :  { %v1390_v59 = vrot.slane %v2903_v57, 7 }
 0x210   :  { %v1391_v60 = vsel %vm1312_vm0, %v1390_v59, %v2908_v58  ;;  %v3058_v59 = vpop.f32.mrb[0].mxu0 }
 0x211   :  { %457 = vrot.lane.b32.xlu0 %v2549_v15, %s2493_s1  ;;  %1393 = vrot.lane.b32.xlu1 %v1391_v60, %s2489_s22  ;;  %v3060_v60 = vpop.f32.mrb[1].mxu0 }
 0x215   :  { %469 = vrot.lane.b32.xlu0 %v467_v0, %s2493_s1  ;;  %v3062_v0 = vpop.f32.mrb[2].mxu0 }
 0x219   :  { %481 = vrot.lane.b32.xlu0 %v479_v61, %s2493_s1  ;;  %v3068_v61 = vadd.f32 %v2888_v45, %v2883_v43  ;;  %v2421_v43 = vpack.i.bf16 %v2985_v41, %v2980_v21  ;;  %v2431_v45 = vpack.i.bf16 %v3014_v46, %v3009_v20 }
 0x21a   :  { %v3004_v30 = vpop.permute.xlu1 %244 }
 0x21b   :  { %4068 = vst [vmem:[#allocation8_spill] sm:$0xff] %v3004_v30  ;;  %v3018_v47 = vmul.f32 %v3004_v30, %v235_v24  ;;  %v101_v24 = vld [vmem:[%s4010_s2 + $0x100] sm:$0xff] }
 0x21d   :  { %493 = vrot.lane.b32.xlu0 %v491_v62, %s2493_s1  ;;  %v3040_v53 = vrot.slane %v3018_v47, %v315_v29  ;;  %v3046_v55 = vrot.slane %v3018_v47, %v2818_v19  ;;  %v3056_v2 = vrot.slane %v3018_v47, %v4015_v56  ;;  %v2401_v62 = vpack.i.bf16 %v2933_v1, %v2928_v4 }
 0x21f   :  { %4073 = vst [vmem:[#allocation13_spill] sm:$0xff] %v3040_v53  ;;  %4074 = vst [vmem:[#allocation14_spill] sm:$0xff] %v3046_v55 }
 0x220   :  { %4075 = vst [vmem:[#allocation15_spill] sm:$0xff] %v3056_v2 }
 0x221   :  { %505 = vrot.lane.b32.xlu0 %v503_v63, %s2493_s1  ;;  %v2411_v63 = vpack.i.bf16 %v2959_v11, %v2954_v10 }
 0x225   :  { %517 = vrot.lane.b32.xlu0 %v515_v3, %s2493_s1  ;;  %v3086_v3 = vpop.f32.mrb[3].mxu0 }
 0x229   :  { %529 = vrot.lane.b32.xlu0 %v527_v8, %s2493_s1  ;;  %v460_v8 = vpop.permute.xlu1 %459 }
 0x22d   :  { %541 = vrot.lane.b32.xlu0 %v539_v17, %s2493_s1  ;;  %v472_v48 = vpop.permute.xlu1 %471 }
 0x231   :  { %248 = vperm.xlu0 %2395, %v2556_v16   ;;  %v484_v9 = vpop.permute.xlu1 %483 }
 0x235   :  { %543 = vrot.lane.b32.xlu0 %v540_v28, %s2493_s1  ;;  %v102_v28 = vld [vmem:[%s4010_s2 + $0x110] sm:$0xff] }
 0x239   :  { %371 = vrot.lane.b32.xlu0 %v3040_v53, %s2493_s1 }
 0x23d   :  { %347 = vrot.lane.b32.xlu0 %v3046_v55, %s2493_s1 }
 0x241   :  { %267 = vrot.lane.b32.xlu0 %v3018_v47, %s2493_s1 }
 0x245   :  { %387 = vrot.lane.b32.xlu0 %v3056_v2, %s2489_s22 }
 0x249   :  { %880 = vrot.lane.b32.xlu0 %v3068_v61, %s2490_s5 }
 0x24d   :  { %892 = vrot.lane.b32.xlu0 %v3068_v61, %s2493_s1 }
 0x251   :  { %2402 = vrot.lane.b32.xlu0 %v2401_v62, %s2493_s1  ;;  %v2243_v62 = vpack.c.bf16 %v102_v28, %v101_v24  ;;  %v104_v24 = vld [vmem:[%s4010_s2 + $0x130] sm:$0xff] }
 0x252   :  { %v2247_v12 = vpack.c.bf16 %v104_v24, %v103_v27  ;;  %v105_v27 = vld [vmem:[%s4010_s2 + $0x140] sm:$0xff]  ;;  %v106_v24 = vld [vmem:[%s4010_s2 + $0x150] sm:$0xff] }
 0x253   :  { %2244 = vmatprep.subr.bf16.mxu0 %v2243_v62  ;;  %v88_v62 = vld [vmem:[%s4010_s2 + $0x30] sm:$0xff] }
 0x255   :  { %2412 = vrot.lane.b32.xlu0 %v2411_v63, %s2493_s1  ;;  %v85_v63 = vld [vmem:[%s4010_s2] sm:$0xff] }
 0x259   :  { %2422 = vrot.lane.b32.xlu0 %v2421_v43, %s2493_s1  ;;  %v86_v43 = vld [vmem:[%s4010_s2 + $0x10] sm:$0xff] }
 0x25d   :  { %2432 = vrot.lane.b32.xlu0 %v2431_v45, %s2493_s1  ;;  %v2245_v45 = vpack.c.bf16 %v86_v43, %v85_v63  ;;  %v2249_v63 = vpack.c.bf16 %v88_v62, %v87_v18 }
 0x25f   :  { %2246 = vmatpush3.bf16.msra.mxu0 %v2245_v45 }
 0x260   :  { %2248 = vmatprep.subr.bf16.mxu0 %v2247_v12  ;;  %v89_v12 = vld [vmem:[%s4010_s2 + $0x40] sm:$0xff] }
 0x263   :  { %2250 = vmatpush3.bf16.msra.mxu0 %v2249_v63 }
 0x27b   :  { %v1493_v17 = vpop.permute.xlu0 %1492 }
 0x27c   :  { %v1495_v38 = vrot.slane %v1493_v17, 1 }
 0x27e   :  { %v3113_v43 = vadd.f32 %v1495_v38, %v2890_v25  ;;  %v90_v38 = vld [vmem:[%s4010_s2 + $0x50] sm:$0xff] }
 0x27f   :  { %v1431_v40 = vpop.permute.xlu0 %1430 }
 0x280   :  { %v1433_v28 = vrot.slane %v1431_v40, 1  ;;  %v3125_v18 = vmax.f32 %v2900_v54, %v1431_v40  ;;  %v1502_v54 = vrot.slane %v3113_v43, 7  ;;  %v108_v40 = vld [vmem:[%s4010_s2 + $0x170] sm:$0xff] }
 0x282   :  { %v3116_v45 = vmax.f32 %v2895_v52, %v1433_v28  ;;  %v2251_v52 = vpack.c.bf16 %v106_v24, %v105_v27  ;;  %v2253_v28 = vpack.c.bf16 %v90_v38, %v89_v12  ;;  %v91_v24 = vld [vmem:[%s4010_s2 + $0x60] sm:$0xff]  ;;  %v496_v12 = vpop.permute.xlu1 %495 }
 0x283   :  { %v458_v5 = vpop.permute.xlu0 %457 }
 0x284   :  { %v1440_v25 = vrot.slane %v3116_v45, 7  ;;  %2351 = vpush %v458_v5  ;;  %2252 = vmatprep.subr.bf16.mxu0 %v2251_v52  ;;  %v107_v5 = vld [vmem:[%s4010_s2 + $0x160] sm:$0xff] }
 0x285   :  { %2353 = vpush %v460_v8  ;;  %2254 = vmatpush3.bf16.msra.mxu0 %v2253_v28  ;;  %v3145_v8 = vadd.f32 %v1493_v17, %v2892_v49  ;;  %v2255_v27 = vpack.c.bf16 %v108_v40, %v107_v5  ;;  %v109_v17 = vld [vmem:[%s4010_s2 + $0x180] sm:$0xff]  ;;  %v110_v28 = vld [vmem:[%s4010_s2 + $0x190] sm:$0xff] }
 0x286   :  { %v1441_v62 = vsel %vm1312_vm0, %v1440_v25, %v3125_v18  ;;  %v92_v25 = vld [vmem:[%s4010_s2 + $0x70] sm:$0xff]  ;;  %v111_v40 = vld [vmem:[%s4010_s2 + $0x1a0] sm:$0xff] }
 0x287   :  { %1443 = vrot.lane.b32.xlu1 %v1441_v62, %s2489_s22  ;;  %v470_v63 = vpop.permute.xlu0 %469  ;;  %v2257_v52 = vpack.c.bf16 %v92_v25, %v91_v24  ;;  %v1503_v38 = vsel %vm1312_vm0, %v1502_v54, %v3145_v8  ;;  %2256 = vmatprep.subr.bf16.mxu0 %v2255_v27  ;;  %v93_v62 = vld [vmem:[%s4010_s2 + $0x80] sm:$0xff]  ;;  %v94_v54 = vld [vmem:[%s4010_s2 + $0x90] sm:$0xff]  ;;  %v508_v25 = vpop.permute.xlu1 %507 }
 0x288   :  { %2355 = vpush %v470_v63  ;;  %v2261_v5 = vpack.c.bf16 %v94_v54, %v93_v62  ;;  %v112_v63 = vld [vmem:[%s4010_s2 + $0x1b0] sm:$0xff] }
 0x289   :  { %2357 = vpush %v472_v48  ;;  %2258 = vmatpush3.bf16.msra.mxu0 %v2257_v52  ;;  %v2259_v48 = vpack.c.bf16 %v110_v28, %v109_v17  ;;  %v2263_v24 = vpack.c.bf16 %v112_v63, %v111_v40  ;;  %v96_v52 = vld [vmem:[%s4010_s2 + $0xb0] sm:$0xff]  ;;  %v113_v28 = vld [vmem:[%s4010_s2 + $0x1c0] sm:$0xff]  ;;  %v3203_v40 = vsub.s32 2, %v2815_v39 }
 0x28a   :  { %v98_v54 = vld [vmem:[%s4010_s2 + $0xd0] sm:$0xff] }
 0x28b   :  { %1505 = vrot.lane.b32.xlu1 %v1503_v38, %s2489_s22  ;;  %v482_v49 = vpop.permute.xlu0 %481  ;;  %2260 = vmatprep.subr.bf16.mxu0 %v2259_v48  ;;  %v4016_v38 = vsub.s32 6, %v2815_v39  ;;  %v114_v48 = vld [vmem:[%s4010_s2 + $0x1d0] sm:$0xff] }
 0x28c   :  { %2359 = vpush %v482_v49  ;;  %v2267_v62 = vpack.c.bf16 %v114_v48, %v113_v28  ;;  %v3221_v28 = vrot.slane %v3018_v47, %v3203_v40 }
 0x28d   :  { %2361 = vpush %v484_v9  ;;  %2262 = vmatpush3.bf16.msra.mxu0 %v2261_v5  ;;  %v95_v9 = vld [vmem:[%s4010_s2 + $0xa0] sm:$0xff]  ;;  %v3200_v5 = vrot.slane %v3018_v47, %v4016_v38 }
 0x28e   :  { %2264 = vmatprep.subr.bf16.mxu0 %v2263_v24  ;;  %v2265_v49 = vpack.c.bf16 %v96_v52, %v95_v9  ;;  %v115_v9 = vld [vmem:[%s4010_s2 + $0x1e0] sm:$0xff]  ;;  %v116_v52 = vld [vmem:[%s4010_s2 + $0x1f0] sm:$0xff]  ;;  %4077 = vst [vmem:[#allocation17_spill] sm:$0xff] %v3221_v28 }
 0x28f   :  { %v494_v27 = vpop.permute.xlu0 %493  ;;  %255 = vrot.lane.b32.xlu1 %v3018_v47, %s2490_s5  ;;  %4076 = vst [vmem:[#allocation16_spill] sm:$0xff] %v3200_v5 }
 0x290   :  { %2363 = vpush %v494_v27  ;;  %v520_v27 = vpop.permute.xlu1 %519 }
 0x291   :  { %2365 = vpush %v496_v12  ;;  %2266 = vmatpush3.bf16.msra.mxu0 %v2265_v49  ;;  %v97_v12 = vld [vmem:[%s4010_s2 + $0xc0] sm:$0xff] }
 0x292   :  { %v2269_v63 = vpack.c.bf16 %v98_v54, %v97_v12  ;;  %2268 = vmatprep.subr.bf16.mxu0 %v2267_v62  ;;  %v99_v49 = vld [vmem:[%s4010_s2 + $0xe0] sm:$0xff]  ;;  %v3227_v54 = vrot.slane %v3018_v47, %v2875_v34 }
 0x293   :  { %v506_v17 = vpop.permute.xlu0 %505  ;;  %261 = vrot.lane.b32.xlu1 %v3018_v47, %s2489_s22 }
 0x294   :  { %2367 = vpush %v506_v17  ;;  %v100_v17 = vld [vmem:[%s4010_s2 + $0xf0] sm:$0xff]  ;;  %v532_v12 = vpop.permute.xlu1 %531  ;;  %4078 = vst [vmem:[#allocation18_spill] sm:$0xff] %v3227_v54 }
 0x295   :  { %2369 = vpush %v508_v25  ;;  %2270 = vmatpush3.bf16.msra.mxu0 %v2269_v63  ;;  %v2271_v25 = vpack.c.bf16 %v116_v52, %v115_v9  ;;  %v2273_v48 = vpack.c.bf16 %v100_v17, %v99_v49  ;;  %v4013_v63 = vmov 0.0|0.0   ;;  %v1218_v9 = vsel %vm161_vm1, %v2549_v15, 0.0 }
 0x296   :  { %v1225_v52 = vsel %vm161_vm1, %v2556_v16, 0.0  ;;  %v1219_v49 = vrot.slane %v1218_v9, 4 }
 0x297   :  { %v518_v24 = vpop.permute.xlu0 %517  ;;  %379 = vrot.lane.b32.xlu1 %v3200_v5, %s2490_s5  ;;  %2272 = vmatprep.subr.bf16.mxu0 %v2271_v25  ;;  %v2406_v25 = vpack.i.bf16 %v2971_v14, %v2966_v13  ;;  %v1226_v17 = vrot.slane %v1225_v52, 4 }
 0x298   :  { %2371 = vpush %v518_v24 }
 0x299   :  { %2373 = vpush %v520_v27  ;;  %2274 = vmatpush3.bf16.msra.mxu0 %v2273_v48  ;;  %v2396_v27 = vpack.i.bf16 %v2945_v7, %v2940_v6  ;;  %v2416_v48 = vpack.i.bf16 %v2997_v23, %v2992_v22 }
 0x29a   :  { %2307 = vmatprep.subr.bf16.mxu0 %v4013_v63 }
 0x29b   :  { %v530_v62 = vpop.permute.xlu0 %529  ;;  %355 = vrot.lane.b32.xlu1 %v3221_v28, %s2490_s5 }
 0x29c   :  { %2375 = vpush %v530_v62  ;;  %v1220_v62 = vadd.f32 %v1219_v49, %v1218_v9  ;;  %v1242_v9 = vsel %vm161_vm1, %v2556_v16, inf }
 0x29d   :  { %2377 = vpush %v532_v12  ;;  %v1227_v12 = vadd.f32 %v1226_v17, %v1225_v52  ;;  %v1249_v17 = vsel %vm161_vm1, %v2549_v15, -inf  ;;  %v1243_v5 = vrot.slane %v1242_v9, 4 }
 0x29e   :  { %v1221_v37 = vrot.slane %v1220_v62, 2 }
 0x29f   :  { %v542_v24 = vpop.permute.xlu0 %541  ;;  %363 = vrot.lane.b32.xlu1 %v3227_v54, %s2489_s22  ;;  %v1228_v56 = vrot.slane %v1227_v12, 2 }
 0x2a0   :  { %2379 = vpush %v542_v24  ;;  %v2426_v24 = vpack.i.bf16 %v3032_v51, %v3027_v50  ;;  %v1222_v38 = vadd.f32 %v1221_v37, %v1220_v62  ;;  %v1250_v37 = vrot.slane %v1249_v17, 4  ;;  %v3315_v51 = vpop.permute.xlu1 %1393 }
 0x2a1   :  { %v1229_v28 = vadd.f32 %v1228_v56, %v1227_v12 }
 0x2a2   :  { %v1223_v12 = vrot.slane %v1222_v38, 1 }
 0x2a3   :  { %886 = vrot.lane.b32.xlu1 %v3068_v61, %s2489_s22 }
 0x2a4   :  { %v1224_v53 = vadd.f32 %v1223_v12, %v1222_v38 }
 0x2a7   :  { %2397 = vrot.lane.b32.xlu1 %v2396_v27, %s2493_s1  ;;  %v1235_v27 = vsel %vm161_vm1, %v2549_v15, inf  ;;  %v3281_v15 = vld [vmem:[%s4010_s2 + $0x118] sm:$0xff] }
 0x2a8   :  { %v1236_v52 = vrot.slane %v1235_v27, 4 }
 0x2ab   :  { %2407 = vrot.lane.b32.xlu1 %v2406_v25, %s2493_s1 }
 0x2af   :  { %2417 = vrot.lane.b32.xlu1 %v2416_v48, %s2493_s1  ;;  %v1256_v48 = vsel %vm161_vm1, %v2556_v16, -inf  ;;  %v1237_v16 = vmin.f32 %v1235_v27, %v1236_v52 }
 0x2b0   :  { %v3251_v63 = vpop.permute.xlu0 %248  ;;  %v1257_v56 = vrot.slane %v1256_v48, 4 }
 0x2b1   :  { %4079 = vst [vmem:[#allocation19_spill] sm:$0xff] %v3251_v63  ;;  %v3255_v25 = vmul.f32 %v3251_v63, %v2867_v31  ;;  %v1238_v2 = vrot.slane %v1237_v16, 2 }
 0x2b2   :  { %v1258_v54 = vmax.f32 %v1256_v48, %v1257_v56 }
 0x2b3   :  { %2427 = vrot.lane.b32.xlu1 %v2426_v24, %s2493_s1  ;;  %v3263_v49 = vrot.slane %v3255_v25, %v315_v29  ;;  %v3276_v29 = vld [vmem:[%s4010_s2 + $0x108] sm:$0xff]  ;;  %v3287_v62 = vrot.slane %v3255_v25, %v2818_v19  ;;  %v1251_v24 = vmax.f32 %v1249_v17, %v1250_v37  ;;  %v4083_v17 = vsub.s32 6, %v2815_v39 }
 0x2b4   :  { %v544_v31 = vpop.permute.xlu0 %543  ;;  %v2436_v27 = vpack.i.bf16 %v3281_v15, %v3276_v29  ;;  %v1259_v37 = vrot.slane %v1258_v54, 2 }
 0x2b5   :  { %4080 = vst [vmem:[#allocation20_spill] sm:$0xff] %v3263_v49  ;;  %2381 = vpush %v544_v31  ;;  %373 = vrot.lane.b32.xlu0 %v3263_v49, %s2493_s1  ;;  %s3271_s8 = spop %2351  ;;  %v1244_v31 = vmin.f32 %v1242_v9, %v1243_v5  ;;  %v1230_v49 = vrot.slane %v1229_v28, 1  ;;  %v3323_v48 = vrot.slane %v3255_v25, %v4083_v17  ;;  %v1396_v17 = vrot.slane %v3315_v51, 1 }
 0x2b6   :  { %4081 = vst [vmem:[#allocation21_spill] sm:$0xff] %v3287_v62  ;;  %s3289_s13 = spop %2353  ;;  %v4082_v9 = vstv %s3271_s8 }
 0x2b7   :  { %257 = vrot.lane.b32.xlu1 %v3255_v25, %s2490_s5  ;;  %v4029_v5 = vstv %s3289_s13  ;;  %v1245_v46 = vrot.slane %v1244_v31, 2  ;;  %v1231_v50 = vadd.f32 %v1230_v49, %v1229_v28  ;;  %4084 = vst [vmem:[#allocation22_spill] sm:$0xff] %v3323_v48  ;;  %v1239_v28 = vmin.f32 %v1237_v16, %v1238_v2 }
 0x2b8   :  { %v1252_v49 = vrot.slane %v1251_v24, 2 }
 0x2b9   :  { %349 = vrot.lane.b32.xlu0 %v3287_v62, %s2493_s1  ;;  %s3294_s14 = spop %2355  ;;  %v1246_v16 = vmin.f32 %v1244_v31, %v1245_v46  ;;  %v1240_v46 = vrot.slane %v1239_v28, 1  ;;  %v1260_v31 = vmax.f32 %v1258_v54, %v1259_v37  ;;  %v2487_v37 = vld [vmem:[%s4007_s0 + $0x10] sm:$0xff] }
 0x2ba   :  { %v4033_v52 = vstv %s3294_s14  ;;  %s3299_s15 = spop %2357 }
 0x2bb   :  { %v564_v62 = vsel %vm563_vm2, %v4082_v9, %v4033_v52  ;;  %263 = vrot.lane.b32.xlu1 %v3255_v25, %s2489_s22  ;;  %v4031_v55 = vstv %s3299_s15  ;;  %v3338_v9 = vmul.f32 0.125, %v1224_v53  ;;  %v3356_v53 = vld [vmem:[%s4010_s2 + $0x128] sm:$0xff]  ;;  %v2486_v52 = vld [vmem:[%s4007_s0] sm:$0xff] }
 0x2bc   :  { %v565_v20 = vsel %vm563_vm2, %v4029_v5, %v4031_v55  ;;  %v3344_v5 = vmul.f32 0.125, %v1231_v50  ;;  %v1253_v50 = vmax.f32 %v1251_v24, %v1252_v49  ;;  %v1400_v24 = vmin.f32 %v2903_v57, %v1396_v17 }
 0x2bd   :  { %s3317_s16 = spop %2359  ;;  %2437 = vrot.lane.b32.xlu0 %v2436_v27, %s2493_s1  ;;  %v3336_v27 = vrot.slane %v3255_v25, %v3203_v40  ;;  %v1247_v49 = vrot.slane %v1246_v16, 1  ;;  %v4087_v57 = vsub.s32 7, %v2815_v39 }
 0x2be   :  { %v4032_v38 = vstv %s3317_s16  ;;  %s3326_s17 = spop %2361  ;;  %v1558_v21 = vrot.slane %v1400_v24, 7 }
 0x2bf   :  { %v566_v56 = vsel %vm161_vm1, %v564_v62, %v4032_v38  ;;  %381 = vrot.lane.b32.xlu1 %v3323_v48, %s2490_s5  ;;  %v4030_v12 = vstv %s3326_s17  ;;  %4085 = vst [vmem:[#allocation23_spill] sm:$0xff] %v3336_v27  ;;  %v3371_v38 = vrot.slane %v3255_v25, %v2875_v34  ;;  %v1263_v48 = vsub.f32 %v2486_v52, %v3338_v9 }
 0x2c0   :  { %v567_v2 = vsel %vm161_vm1, %v565_v20, %v4030_v12  ;;  %v3361_v20 = vld [vmem:[%s4010_s2 + $0x138] sm:$0xff]  ;;  %v3392_v52 = vrot.slane %v3255_v25, %v4087_v57  ;;  %v1241_v57 = vmin.f32 %v1239_v28, %v1240_v46  ;;  %v1248_v22 = vmin.f32 %v1246_v16, %v1247_v49 }
 0x2c1   :  { %s3346_s18 = spop %2363  ;;  %357 = vrot.lane.b32.xlu0 %v3336_v27, %s2490_s5  ;;  %4086 = vst [vmem:[#allocation24_spill] sm:$0xff] %v3371_v38  ;;  %v2441_v17 = vpack.i.bf16 %v3361_v20, %v3356_v53 }
 0x2c2   :  { %v4036_v62 = vstv %s3346_s18  ;;  %s3351_s20 = spop %2365  ;;  %4088 = vst [vmem:[#allocation25_spill] sm:$0xff] %v3392_v52 }
 0x2c3   :  { %v569_v12 = vsel %vm568_vm3, %v566_v56, %v4036_v62  ;;  %v4035_v55 = vstv %s3351_s20  ;;  %269 = vrot.lane.b32.xlu1 %v3255_v25, %s2493_s1  ;;  %v1264_v56 = vsub.f32 %v2487_v37, %v3344_v5  ;;  %v1254_v37 = vrot.slane %v1253_v50, 1 }
 0x2c4   :  { %v570_v54 = vsel %vm568_vm3, %v567_v2, %v4035_v55  ;;  %v1261_v55 = vrot.slane %v1260_v31, 1 }
 0x2c5   :  { %s3385_s30 = spop %2367  ;;  %365 = vrot.lane.b32.xlu0 %v3371_v38, %s2489_s22  ;;  %v1265_v38 = vmul.f32 %v1263_v48, %v1263_v48  ;;  %v1266_v23 = vmul.f32 %v1264_v56, %v1264_v56  ;;  %v1255_v48 = vmax.f32 %v1253_v50, %v1254_v37 }
 0x2c6   :  { %v4043_v2 = vstv %s3385_s30  ;;  %s3397_s0 = spop %2369  ;;  %v1262_v28 = vmax.f32 %v1260_v31, %v1261_v55 }
 0x2c7   :  { %v571_v62 = vsel %vm275_vm4, %v569_v12, %v4043_v2  ;;  %389 = vrot.lane.b32.xlu1 %v3392_v52, %s2489_s22  ;;  %v4046_v27 = vstv %s3397_s0  ;;  %v1399_v12 = vmin.f32 %v2908_v58, %v3315_v51  ;;  %v1267_v24 = vsel %vm161_vm1, %v1265_v38, 0.0 }
 0x2c8   :  { %v572_v41 = vsel %vm275_vm4, %v570_v54, %v4046_v27  ;;  %v1535_v51 = vsel %vm1312_vm0, %v1248_v22, %v1241_v57  ;;  %v1274_v49 = vsel %vm161_vm1, %v1266_v23, 0.0  ;;  %v1541_v38 = vsel %vm1312_vm0, %v1262_v28, %v1255_v48 }
 0x2c9   :  { %s3408_s6 = spop %2371  ;;  %882 = vrot.lane.b32.xlu0 %v2886_v44, %s2490_s5  ;;  %v1559_v58 = vsel %vm1312_vm0, %v1558_v21, %v1399_v12  ;;  %v1275_v23 = vrot.slane %v1274_v49, 4 }
 0x2ca   :  { %v522_v2 = vstv %s3408_s6  ;;  %s3415_s7 = spop %2373 }
 0x2cb   :  { %v574_v16 = vsel %vm573_vm5, %v571_v62, %v522_v2  ;;  %2442 = vrot.lane.b32.xlu1 %v2441_v17, %s2493_s1  ;;  %v4047_v46 = vstv %s3415_s7  ;;  %v1276_v17 = vadd.f32 %v1275_v23, %v1274_v49 }
 0x2cc   :  { %v575_v54 = vsel %vm573_vm5, %v572_v41, %v4047_v46  ;;  %v1268_v41 = vrot.slane %v1267_v24, 4 }
 0x2cd   :  { %s3429_s9 = spop %2375  ;;  %1560 = vrot.lane.b32.xlu0 %v1559_v58, %s2488_s19  ;;  %v1277_v57 = vrot.slane %v1276_v17, 2 }
 0x2ce   :  { %v534_v55 = vstv %s3429_s9  ;;  %s3433_s10 = spop %2377  ;;  %v1269_v31 = vadd.f32 %v1268_v41, %v1267_v24  ;;  %v372_v41 = vpop.permute.xlu0 %371 }
 0x2cf   :  { %v576_v21 = vsel %vm278_vm6, %v574_v16, %v534_v55  ;;  %1536 = vrot.lane.b32.xlu1 %v1535_v51, %s2490_s5  ;;  %v4045_v22 = vstv %s3433_s10  ;;  %v1278_v48 = vadd.f32 %v1277_v57, %v1276_v17 }
 0x2d0   :  { %v577_v62 = vsel %vm278_vm6, %v575_v54, %v4045_v22  ;;  %v1270_v37 = vrot.slane %v1269_v31, 2 }
 0x2d1   :  { %s3442_s11 = spop %2379  ;;  %1542 = vrot.lane.b32.xlu0 %v1541_v38, %s2489_s22  ;;  %v1279_v16 = vrot.slane %v1278_v48, 1 }
 0x2d2   :  { %v4048_v50 = vstv %s3442_s11  ;;  %v1271_v12 = vadd.f32 %v1270_v37, %v1269_v31 }
 0x2d3   :  { %v3449_v56 = vsel %vm578_vm7, %v576_v21, %v4048_v50  ;;  %888 = vrot.lane.b32.xlu1 %v2886_v44, %s2489_s22  ;;  %v1280_v58 = vadd.f32 %v1279_v16, %v1278_v48  ;;  %v3463_v21 = vpop.permute.xlu0 %347 }
 0x2d4   :  { %4089 = vst [vmem:[#allocation26_spill] sm:$0xff] %v3449_v56  ;;  %v1272_v28 = vrot.slane %v1271_v12, 1 }
 0x2d5   :  { %894 = vrot.lane.b32.xlu0 %v2886_v44, %s2493_s1  ;;  %v1283_v38 = vmul.f32 0.14285715, %v1280_v58 }
 0x2d6   :  { %v1273_v54 = vadd.f32 %v1272_v28, %v1271_v12 }
 0x2d7   :  { %v268_v57 = vpop.permute.xlu0 %267  ;;  %vm1293_vm9 = vcmp.eq.f32.partialorder %v1283_v38, inf  ;;  %vm1295_vm11 = vcmp.eq.f32.partialorder %v1283_v38, 0.0 }
 0x2d8   :  { %v1282_v24 = vmul.f32 0.14285715, %v1273_v54 }
 0x2da   :  { %2466 = vrsqrt.f32 %v1282_v24  ;;  %vm1286_vm8 = vcmp.eq.f32.partialorder %v1282_v24, inf  ;;  %vm1288_vm10 = vcmp.eq.f32.partialorder %v1282_v24, 0.0  ;;  %v1289_v28 = vand.u32 2147483648, %v1282_v24 }
 0x2db   :  { %2468 = vrsqrt.f32 %v1283_v38 }
 0x2e4   :  { %v2467_v23 = vpop.eup %2466 }
 0x2e5   :  { %v2469_v31 = vpop.eup %2468  ;;  %v1285_v17 = vmul.f32 %v2467_v23, %v1282_v24 }
 0x2e6   :  { %s3455_s12 = spop %2381  ;;  %v1292_v37 = vmul.f32 %v2469_v31, %v1283_v38 }
 0x2e7   :  { %v4044_v51 = vstv %s3455_s12  ;;  %v1287_v54 = vsel %vm1286_vm8, %v1282_v24, %v1285_v17  ;;  %v3502_v17 = vld [vmem:[%s4010_s2 + $0x158] sm:$0xff] }
 0x2e8   :  { %v3461_v49 = vsel %vm578_vm7, %v577_v62, %v4044_v51  ;;  %v1296_v62 = vand.u32 2147483648, %v1283_v38  ;;  %v1294_v58 = vsel %vm1293_vm9, %v1283_v38, %v1292_v37  ;;  %v4091_v51 = vstv %s3385_s30 }
 0x2e9   :  { %4090 = vst [vmem:[#allocation27_spill] sm:$0xff] %v3461_v49  ;;  %v557_v22 = vsel %vm161_vm1, %v4091_v51, %v522_v2  ;;  %v388_v49 = vpop.permute.xlu0 %387  ;;  %v1290_v56 = vsel %vm1288_vm10, %v1289_v28, %v1287_v54  ;;  %v3479_v51 = vsub.s32 1, %v2815_v39  ;;  %v4050_v37 = vsub.s32 5, %v2815_v39 }
 0x2ea   :  { %v1297_v52 = vsel %vm1295_vm11, %v1296_v62, %v1294_v58 }
 0x2ed   :  { %v3517_v62 = vpop.permute.xlu0 %880 }
 0x2ee   :  { %4096 = vst [vmem:[#allocation28_spill] sm:$0xff] %v3517_v62 }
 0x2f9   :  { %v1444_v12 = vpop.permute.xlu1 %1443 }
 0x2fa   :  { %v1446_v48 = vrot.slane %v1444_v12, 1  ;;  %v1449_v23 = vmax.f32 %v3125_v18, %v1444_v12  ;;  %v3484_v18 = vld [vmem:[%s4008_s3 + $0x68] sm:$0xff]  ;;  %v4094_v12 = vstv %s3442_s11 }
 0x2fc   :  { %v1450_v16 = vmax.f32 %v3116_v45, %v1446_v48  ;;  %v559_v45 = vsel %vm275_vm4, %v557_v22, %v534_v55  ;;  %v4093_v55 = vstv %s3271_s8  ;;  %v1547_v22 = vsel %vm1312_vm0, %v1297_v52, %v1290_v56 }
 0x2fd   :  { %v1506_v27 = vpop.permute.xlu1 %1505  ;;  %v3508_v48 = vsel %vm278_vm6, %v559_v45, %v4094_v12  ;;  %v3512_v52 = vrot.slane %v3484_v18, %v3479_v51  ;;  %v4095_v56 = vstv %s3317_s16 }
 0x2fe   :  { %v1565_v31 = vrot.slane %v1450_v16, 7  ;;  %v1508_v46 = vrot.slane %v1506_v27, 1  ;;  %v1511_v50 = vadd.f32 %v1506_v27, %v3145_v8  ;;  %v4092_v27 = vstv %s3294_s14 }
 0x2ff   :  { %v582_v58 = vmul.f32 %v3508_v48, %v3004_v30  ;;  %vm1034_vm9 = vcmp.gt.f32.partialorder %v3508_v48, 0.0 }
 0x300   :  { %v1512_v24 = vadd.f32 %v1508_v46, %v3113_v43  ;;  %v3475_v38 = vmul.f32 0.015873017, %v1511_v50  ;;  %v1566_v2 = vsel %vm1312_vm0, %v1565_v31, %v1449_v23  ;;  %v551_v43 = vsel %vm161_vm1, %v4093_v55, %v4092_v27  ;;  %v3497_v50 = vld [vmem:[%s4010_s2 + $0x148] sm:$0xff] }
 0x301   :  { %v256_v8 = vpop.permute.xlu1 %255  ;;  %1567 = vrot.lane.b32.xlu1 %v1566_v2, %s2490_s5  ;;  %v553_v28 = vsel %vm275_vm4, %v551_v43, %v4095_v56  ;;  %v2446_v54 = vpack.i.bf16 %v3502_v17, %v3497_v50  ;;  %v3527_v23 = vrot.slane %v3018_v47, %v4050_v37  ;;  %v3531_v31 = vrot.slane %v3484_v18, %v3203_v40 }
 0x302   :  { %v1514_v46 = vmul.f32 0.015873017, %v1512_v24  ;;  %2470 = vrsqrt.f32 %v3475_v38  ;;  %v273_v45 = vsel %vm161_vm1, %v3018_v47, %v256_v8  ;;  %v748_v24 = vadd.f32 %v3512_v52, %v2872_v33 }
 0x303   :  { %4097 = vst [vmem:[#allocation29_spill] sm:$0xff] %v3527_v23  ;;  %v4098_v2 = vstv %s3346_s18  ;;  %v3545_v43 = vrot.slane %v2856_v26, %v3479_v51  ;;  %vm1517_vm12 = vcmp.eq.f32.partialorder %v3475_v38, inf  ;;  %vm1519_vm15 = vcmp.eq.f32.partialorder %v3475_v38, 0.0 }
 0x304   :  { %2472 = vrsqrt.f32 %v1514_v46  ;;  %v3540_v27 = vsel %vm278_vm6, %v553_v28, %v4098_v2  ;;  %v752_v8 = vmul.f32 %v748_v24, %v582_v58  ;;  %v764_v28 = vadd.f32 %v3531_v31, %v3060_v60 }
 0x305   :  { %v262_v16 = vpop.permute.xlu1 %261  ;;  %1548 = vrot.lane.b32.xlu1 %v1547_v22, %s2493_s1  ;;  %v399_v22 = vsel %vm161_vm1, %v372_v41, %v3527_v23  ;;  %v581_v33 = vmul.f32 %v3540_v27, %v3004_v30  ;;  %v3563_v24 = vrot.slane %v3018_v47, %v3479_v51  ;;  %v3568_v60 = vrot.slane %v2856_v26, %v3203_v40 }
 0x306   :  { %v276_v55 = vsel %vm275_vm4, %v273_v45, %v262_v16  ;;  %v3555_v16 = vpop.permute.xlu0 %892  ;;  %vm1524_vm13 = vcmp.eq.f32.partialorder %v1514_v46, inf  ;;  %vm1526_vm14 = vcmp.eq.f32.partialorder %v1514_v46, 0.0  ;;  %vm1033_vm8 = vcmp.gt.f32.partialorder %v3540_v27, 0.0 }
 0x307   :  { %v279_v2 = vsel %vm278_vm6, %v276_v55, %v268_v57  ;;  %v393_v57 = vsel %vm161_vm1, %v3463_v21, %v3563_v24  ;;  %v1520_v21 = vand.u32 2147483648, %v3475_v38 }
 0x309   :  { %v380_v12 = vpop.permute.xlu1 %379  ;;  %2447 = vrot.lane.b32.xlu1 %v2446_v54, %s2493_s1  ;;  %v747_v54 = vadd.f32 %v3545_v43, %v2870_v32  ;;  %v768_v32 = vmul.f32 %v764_v28, %v582_v58 }
 0x30a   :  { %v401_v56 = vsel %vm275_vm4, %v399_v22, %v380_v12  ;;  %v2403_v23 = vpop.permute.xlu0 %2402 }
 0x30b   :  { %v403_v45 = vsel %vm278_vm6, %v401_v56, %v388_v49  ;;  %v780_v49 = vadd.f32 1.0, %v752_v8  ;;  %v751_v55 = vmul.f32 %v747_v54, %v581_v33 }
 0x30c   :  { %v2471_v37 = vpop.eup %2470  ;;  %v772_v41 = vmul.f32 %v403_v45, %v279_v2 }
 0x30d   :  { %v356_v22 = vpop.permute.xlu1 %355  ;;  %v1516_v12 = vmul.f32 %v2471_v37, %v3475_v38  ;;  %v1527_v37 = vand.u32 2147483648, %v1514_v46 }
 0x30e   :  { %v2473_v30 = vpop.eup %2472  ;;  %v776_v56 = vmul.f32 0.35355338, %v772_v41  ;;  %v395_v10 = vsel %vm275_vm4, %v393_v57, %v356_v22  ;;  %v3584_v22 = vld [vmem:[%s4010_s2 + $0x168] sm:$0xff] }
 0x30f   :  { %v1523_v45 = vmul.f32 %v2473_v30, %v1514_v46  ;;  %v1518_v26 = vsel %vm1517_vm12, %v3475_v38, %v1516_v12  ;;  %v763_v30 = vadd.f32 %v3568_v60, %v3058_v59  ;;  %v898_v59 = vsel %vm161_vm1, %v3068_v61, %v3517_v62 }
 0x310   :  { %v784_v47 = vmul.f32 %v780_v49, %v776_v56 }
 0x311   :  { %v364_v11 = vpop.permute.xlu1 %363  ;;  %v1525_v40 = vsel %vm1524_vm13, %v1514_v46, %v1523_v45  ;;  %v779_v46 = vadd.f32 1.0, %v751_v55  ;;  %v767_v55 = vmul.f32 %v763_v30, %v581_v33 }
 0x312   :  { %v397_v8 = vsel %vm278_vm6, %v395_v10, %v364_v11  ;;  %v1528_v41 = vsel %vm1526_vm14, %v1527_v37, %v1525_v40  ;;  %v788_v58 = vadd.f32 %v784_v47, %v768_v32  ;;  %v3589_v10 = vld [vmem:[%s4010_s2 + $0x178] sm:$0xff]  ;;  %v1521_v11 = vsel %vm1519_vm15, %v1520_v21, %v1518_v26 }
 0x313   :  { %v771_v28 = vmul.f32 %v397_v8, %v279_v2  ;;  %v1572_v54 = vrot.slane %v1528_v41, 7  ;;  %v2413_v2 = vpop.permute.xlu0 %2412  ;;  %v2451_v57 = vpack.i.bf16 %v3589_v10, %v3584_v22  ;;  %v2405_v37 = vunpack.i.h.bf16 %v2403_v23 }
 0x314   :  { %v2404_v8 = vunpack.i.l.bf16 %v2403_v23  ;;  %v3611_v27 = vsel %vm1034_vm9, %v788_v58, -1e+30 }
 0x315   :  { %v775_v12 = vmul.f32 0.35355338, %v771_v28  ;;  %v3591_v49 = vpop.permute.xlu1 %886  ;;  %v1573_v38 = vsel %vm1312_vm0, %v1572_v54, %v1521_v11 }
 0x316   :  { %4099 = vst [vmem:[#allocation30_spill] sm:$0xff] %v3591_v49  ;;  %v900_v56 = vsel %vm275_vm4, %v898_v59, %v3591_v49  ;;  %1574 = vrot.lane.b32.xlu0 %v1573_v38, %s2495_s27  ;;  %v2311_v23 = vpack.c.bf16 %v2405_v37, %v2404_v8  ;;  %v4100_v38 = vmov 0.0|0.0   ;;  %v4101_v8 = vstv %s3299_s15 }
 0x317   :  { %v783_v32 = vmul.f32 %v779_v46, %v775_v12  ;;  %v902_v45 = vsel %vm278_vm6, %v900_v56, %v3555_v16  ;;  %v2423_v33 = vpop.permute.xlu0 %2422 }
 0x318   :  { %v948_v47 = vadd.f32 1.0, %v902_v45 }
 0x319   :  { %v2398_v26 = vpop.permute.xlu1 %2397  ;;  %v787_v40 = vadd.f32 %v783_v32, %v767_v55  ;;  %v2415_v55 = vunpack.i.h.bf16 %v2413_v2  ;;  %v2414_v32 = vunpack.i.l.bf16 %v2413_v2  ;;  %v4102_v2 = vstv %s3289_s13 }
 0x31a   :  { %v2400_v21 = vunpack.i.h.bf16 %v2398_v26  ;;  %v2399_v41 = vunpack.i.l.bf16 %v2398_v26  ;;  %2452 = vrot.lane.b32.xlu0 %v2451_v57, %s2493_s1  ;;  %v951_v28 = vmul.f32 %v948_v47, %v788_v58 }
 0x31b   :  { %v3606_v54 = vsel %vm1033_vm8, %v787_v40, -1e+30  ;;  %v950_v11 = vmul.f32 %v948_v47, %v787_v40  ;;  %v2433_v57 = vpop.permute.xlu0 %2432  ;;  %v2317_v45 = vpack.c.bf16 %v2415_v55, %v2414_v32  ;;  %v4106_v32 = vstv %s3433_s10 }
 0x31c   :  { %v2308_v30 = vpack.c.bf16 %v2400_v21, %v2399_v41  ;;  %1041 = vrot.lane.b32.xlu1 %v3606_v54, %s2490_s5  ;;  %1018 = vmatprep.mubr.f32.mxu0 %v951_v28  ;;  %v552_v21 = vsel %vm161_vm1, %v4102_v2, %v4101_v8 }
 0x31d   :  { %v2408_v46 = vpop.permute.xlu1 %2407  ;;  %1019 = vmatmul.mubr.f32.vlgmr.msra.gmra.mrb[4].mxu0 %v950_v11  ;;  %v4103_v11 = vstv %s3415_s7 }
 0x31e   :  { %v2410_v12 = vunpack.i.h.bf16 %v2408_v46  ;;  %v2409_v59 = vunpack.i.l.bf16 %v2408_v46  ;;  %1045 = vrot.lane.b32.xlu0 %v3611_v27, %s2490_s5  ;;  %2309 = vmatpush1.bf16.msra.mxu0 %v2308_v30  ;;  %v4104_v30 = vstv %s3397_s0 }
 0x31f   :  { %2310 = vmatprep.subr.bf16.mxu0 %v4100_v38  ;;  %v558_v46 = vsel %vm161_vm1, %v4104_v30, %v4103_v11 }
 0x320   :  { %v2314_v48 = vpack.c.bf16 %v2410_v12, %v2409_v59  ;;  %v2424_v12 = vunpack.i.l.bf16 %v2423_v33  ;;  %v4105_v59 = vstv %s3326_s17 }
 0x321   :  { %v2418_v56 = vpop.permute.xlu1 %2417 }
 0x322   :  { %2312 = vmatpush1.bf16.msra.mxu0 %v2311_v23  ;;  %v2420_v47 = vunpack.i.h.bf16 %v2418_v56  ;;  %v2419_v37 = vunpack.i.l.bf16 %v2418_v56  ;;  %v2425_v23 = vunpack.i.h.bf16 %v2423_v33  ;;  %v554_v56 = vsel %vm275_vm4, %v552_v21, %v4105_v59 }
 0x323   :  { %2313 = vmatprep.subr.bf16.mxu0 %v4100_v38  ;;  %v4108_v33 = vstv %s3455_s12  ;;  %v2434_v59 = vunpack.i.l.bf16 %v2433_v57 }
 0x324   :  { %v2320_v41 = vpack.c.bf16 %v2420_v47, %v2419_v37  ;;  %v2323_v8 = vpack.c.bf16 %v2425_v23, %v2424_v12  ;;  %v3651_v23 = vrot.slane %v3255_v25, %v3479_v51 }
 0x325   :  { %v2428_v58 = vpop.permute.xlu1 %2427 }
 0x326   :  { %2315 = vmatpush1.bf16.msra.mxu0 %v2314_v48  ;;  %v560_v48 = vsel %vm275_vm4, %v558_v46, %v4106_v32  ;;  %v2430_v2 = vunpack.i.h.bf16 %v2428_v58  ;;  %v2429_v11 = vunpack.i.l.bf16 %v2428_v58  ;;  %v2435_v46 = vunpack.i.h.bf16 %v2433_v57 }
 0x327   :  { %v374_v26 = vpop.permute.xlu0 %373  ;;  %2316 = vmatprep.subr.bf16.mxu0 %v4100_v38  ;;  %v3644_v49 = vsel %vm278_vm6, %v560_v48, %v4108_v33  ;;  %v749_v58 = vadd.f32 %v3545_v43, %v2877_v35  ;;  %v750_v35 = vadd.f32 %v3512_v52, %v2879_v42 }
 0x328   :  { %v2326_v32 = vpack.c.bf16 %v2430_v2, %v2429_v11  ;;  %v584_v12 = vmul.f32 %v3644_v49, %v3251_v63  ;;  %v2329_v62 = vpack.c.bf16 %v2435_v46, %v2434_v59 }
 0x329   :  { %v258_v40 = vpop.permute.xlu1 %257 }
 0x32a   :  { %2318 = vmatpush1.bf16.msra.mxu0 %v2317_v45  ;;  %v4107_v45 = vstv %s3351_s20  ;;  %v274_v57 = vsel %vm161_vm1, %v3255_v25, %v258_v40  ;;  %v754_v42 = vmul.f32 %v750_v35, %v584_v12 }
 0x32b   :  { %v350_v28 = vpop.permute.xlu0 %349  ;;  %2319 = vmatprep.subr.bf16.mxu0 %v4100_v38  ;;  %v3639_v37 = vsel %vm278_vm6, %v554_v56, %v4107_v45  ;;  %v4109_v56 = vsub.s32 5, %v2815_v39 }
 0x32c   :  { %v583_v21 = vmul.f32 %v3639_v37, %v3251_v63  ;;  %vm1035_vm10 = vcmp.gt.f32.partialorder %v3639_v37, 0.0 }
 0x32d   :  { %v264_v55 = vpop.permute.xlu1 %263  ;;  %v3660_v48 = vrot.slane %v3255_v25, %v4109_v56 }
 0x32e   :  { %2321 = vmatpush1.bf16.msra.mxu0 %v2320_v41  ;;  %v753_v43 = vmul.f32 %v749_v58, %v583_v21  ;;  %v277_v33 = vsel %vm275_vm4, %v274_v57, %v264_v55 }
 0x32f   :  { %v2438_v47 = vpop.permute.xlu0 %2437  ;;  %2322 = vmatprep.subr.bf16.mxu0 %v4100_v38  ;;  %v400_v25 = vsel %vm161_vm1, %v374_v26, %v3660_v48  ;;  %v766_v26 = vadd.f32 %v3531_v31, %v3086_v3  ;;  %v1531_v3 = vsel %vm1312_vm0, %v3344_v5, %v3338_v9  ;;  %vm1036_vm0 = vcmp.gt.f32.partialorder %v3644_v49, 0.0 }
 0x330   :  { %v2440_v2 = vunpack.i.h.bf16 %v2438_v47  ;;  %v2439_v11 = vunpack.i.l.bf16 %v2438_v47  ;;  %v765_v47 = vadd.f32 %v3568_v60, %v3062_v0  ;;  %v781_v46 = vadd.f32 1.0, %v753_v43 }
 0x331   :  { %v382_v30 = vpop.permute.xlu1 %381 }
 0x332   :  { %2324 = vmatpush1.bf16.msra.mxu0 %v2323_v8  ;;  %v394_v8 = vsel %vm161_vm1, %v350_v28, %v3651_v23  ;;  %v402_v52 = vsel %vm275_vm4, %v400_v25, %v382_v30  ;;  %v769_v0 = vmul.f32 %v765_v47, %v583_v21 }
 0x333   :  { %v358_v41 = vpop.permute.xlu0 %357  ;;  %2325 = vmatprep.subr.bf16.mxu0 %v4100_v38 }
 0x334   :  { %v396_v63 = vsel %vm275_vm4, %v394_v8, %v358_v41  ;;  %v2332_v41 = vpack.c.bf16 %v2440_v2, %v2439_v11  ;;  %v770_v11 = vmul.f32 %v766_v26, %v584_v12 }
 0x335   :  { %v270_v45 = vpop.permute.xlu1 %269 }
 0x336   :  { %2327 = vmatpush1.bf16.msra.mxu0 %v2326_v32  ;;  %v280_v40 = vsel %vm278_vm6, %v277_v33, %v270_v45 }
 0x337   :  { %v366_v56 = vpop.permute.xlu0 %365  ;;  %2328 = vmatprep.subr.bf16.mxu0 %v4100_v38 }
 0x338   :  { %v398_v28 = vsel %vm278_vm6, %v396_v63, %v366_v56  ;;  %v782_v63 = vadd.f32 1.0, %v754_v42 }
 0x339   :  { %v773_v55 = vmul.f32 %v398_v28, %v280_v40  ;;  %v390_v32 = vpop.permute.xlu1 %389 }
 0x33a   :  { %v404_v58 = vsel %vm278_vm6, %v402_v52, %v390_v32  ;;  %2330 = vmatpush1.bf16.msra.mxu0 %v2329_v62 }
 0x33b   :  { %v777_v59 = vmul.f32 0.35355338, %v773_v55  ;;  %v774_v45 = vmul.f32 %v404_v58, %v280_v40  ;;  %v3681_v57 = vpop.permute.xlu0 %882  ;;  %2331 = vmatprep.subr.bf16.mxu0 %v4100_v38 }
 0x33c   :  { %v899_v28 = vsel %vm161_vm1, %v2886_v44, %v3681_v57 }
 0x33d   :  { %v785_v60 = vmul.f32 %v781_v46, %v777_v59  ;;  %v778_v30 = vmul.f32 0.35355338, %v774_v45  ;;  %v2443_v8 = vpop.permute.xlu1 %2442 }
 0x33e   :  { %v2445_v35 = vunpack.i.h.bf16 %v2443_v8  ;;  %v2444_v2 = vunpack.i.l.bf16 %v2443_v8  ;;  %2333 = vmatpush1.bf16.msra.mxu0 %v2332_v41 }
 0x33f   :  { %v786_v62 = vmul.f32 %v782_v63, %v778_v30  ;;  %v1561_v43 = vpop.permute.xlu0 %1560  ;;  %v789_v31 = vadd.f32 %v785_v60, %v769_v0  ;;  %2334 = vmatprep.subr.bf16.mxu0 %v4100_v38  ;;  %v2496_v0 = vmov 1966171168  }
 0x340   :  { %v2335_v33 = vpack.c.bf16 %v2445_v35, %v2444_v2  ;;  %v1580_v21 = vsel %vm563_vm2, %v2831_v36, %v1561_v43  ;;  %v1587_v63 = vunpack.c.l.s4 %v2496_v0  ;;  %v4110_v43 = vlaneseq }
 0x341   :  { %v1537_v56 = vpop.permute.xlu1 %1536  ;;  %v3691_v25 = vsel %vm1035_vm10, %v789_v31, -1e+30  ;;  %v790_v40 = vadd.f32 %v786_v62, %v770_v11 }
 0x342   :  { %v1577_v12 = vsel %vm161_vm1, %v1531_v3, %v1537_v56  ;;  %1043 = vrot.lane.b32.xlu1 %v3691_v25, %s2490_s5  ;;  %2336 = vmatpush1.bf16.msra.mxu0 %v2335_v33  ;;  %v1588_v60 = vunpack.c.0.s8 %v1587_v63  ;;  %v3720_v3 = vand.u32 127, %v4110_v43 }
 0x343   :  { %v1543_v5 = vpop.permute.xlu0 %1542  ;;  %v3697_v9 = vsel %vm1036_vm0, %v790_v40, -1e+30  ;;  %2337 = vmatprep.subr.bf16.mxu0 %v4100_v38 }
 0x344   :  { %v1578_v36 = vsel %vm275_vm4, %v1577_v12, %v1543_v5  ;;  %1047 = vrot.lane.b32.xlu0 %v3697_v9, %s2490_s5  ;;  %v1591_v8 = vsub.s32 %v1588_v60, %v2815_v39  ;;  %vm1051_vm11 = vcmp.lt.s32.totalorder %v3720_v3, 32  ;;  %vm1068_vm12 = vcmp.lt.s32.totalorder %v3720_v3, 64 }
 0x345   :  { %v3703_v37 = vpop.permute.xlu1 %888 }
 0x346   :  { %v901_v49 = vsel %vm275_vm4, %v899_v28, %v3703_v37 }
 0x347   :  { %v3710_v47 = vpop.permute.xlu0 %894 }
 0x348   :  { %v903_v42 = vsel %vm278_vm6, %v901_v49, %v3710_v47 }
 0x349   :  { %v949_v52 = vadd.f32 1.0, %v903_v42 }
 0x34b   :  { %v953_v55 = vmul.f32 %v949_v52, %v790_v40  ;;  %v952_v32 = vmul.f32 %v949_v52, %v789_v31 }
 0x34d   :  { %1023 = vmatprep.mubr.f32.mxu0 %v953_v55 }
 0x34e   :  { %1024 = vmatmul.mubr.f32.gmra.mrb[6].mxu0 %v952_v32 }
 0x373   :  { %v1568_v41 = vpop.permute.xlu1 %1567 }
 0x374   :  { %v1581_v30 = vsel %vm161_vm1, %v1580_v21, %v1568_v41 }
 0x377   :  { %v1549_v58 = vpop.permute.xlu1 %1548 }
 0x378   :  { %v1579_v2 = vsel %vm278_vm6, %v1578_v36, %v1549_v58 }
 0x37b   :  { %v2448_v46 = vpop.permute.xlu1 %2447 }
 0x37c   :  { %v2450_v26 = vunpack.i.h.bf16 %v2448_v46  ;;  %v2449_v59 = vunpack.i.l.bf16 %v2448_v46 }
 0x37e   :  { %v2338_v45 = vpack.c.bf16 %v2450_v26, %v2449_v59 }
 0x380   :  { %2339 = vmatpush1.bf16.msra.mxu0 %v2338_v45 }
 0x381   :  { %2340 = vmatprep.subr.bf16.mxu0 %v4100_v38 }
 0x388   :  { %v1575_v35 = vpop.permute.xlu0 %1574 }
 0x389   :  { %v1582_v11 = vsel %vm568_vm3, %v1581_v30, %v1575_v35 }
 0x38a   :  { %v1585_v62 = vcombine.low %v1579_v2, %v1582_v11 }
 0x38c   :  { %v1592_v31 = vrot.slane %v1585_v62, %v1591_v8  ;;  %v2453_v33 = vpop.permute.xlu0 %2452 }
 0x38d   :  { %v2455_v56 = vunpack.i.h.bf16 %v2453_v33  ;;  %v2454_v40 = vunpack.i.l.bf16 %v2453_v33 }
 0x38e   :  { %v1593_v12 = vcombine.high %v1592_v31, %v1592_v31  ;;  %v1600_v38 = vrot.slane %v1592_v31, %v1591_v8  ;;  %v1042_v39 = vpop.permute.xlu1 %1041 }
 0x38f   :  { %v2341_v21 = vpack.c.bf16 %v2455_v56, %v2454_v40 }
 0x390   :  { %v1607_v5 = vrot.slane %v1593_v12, %v1591_v8  ;;  %v1046_v28 = vpop.permute.xlu0 %1045  ;;  %v1615_v36 = vrot.slane %v1600_v38, %v3479_v51  ;;  %v1611_v41 = vrot.slane %v1600_v38, %v2818_v19 }
 0x391   :  { %v1052_v49 = vsel %vm1051_vm11, %v1042_v39, %v1046_v28  ;;  %v1054_v42 = vsel %vm1051_vm11, %v1046_v28, %v1042_v39  ;;  %2342 = vmatpush1.bf16.msra.mxu0 %v2341_v21 }
 0x392   :  { %v1056_v52 = vmax.f32 %v3606_v54, %v1054_v42  ;;  %v1057_v55 = vmax.f32 %v3611_v27, %v1052_v49  ;;  %2035 = vmatprep.mubr.msk.f32.mxu0 %vm275_vm4, %v1615_v36  ;;  %v1623_v32 = vrot.slane %v1607_v5, %v3479_v51  ;;  %v1619_v58 = vrot.slane %v1607_v5, %v2818_v19 }
 0x394   :  { %1060 = vrot.lane.b32.xlu1 %v1056_v52, %s2489_s22  ;;  %1064 = vrot.lane.b32.xlu0 %v1057_v55, %s2489_s22 }
 0x395   :  { %1791 = vmatmul.mubr.f32.vlgmr.msra.gmra.mrb[8].mxu0 %v1611_v41 }
 0x396   :  { %2036 = vmatprep.mubr.msk.f32.mxu0 %vm275_vm4, %v1623_v32 }
 0x399   :  { %1796 = vmatmul.mubr.f32.gmra.mrb[10].mxu0 %v1619_v58 }
 0x3b4   :  { %v1044_v46 = vpop.permute.xlu1 %1043 }
 0x3b6   :  { %v1048_v26 = vpop.permute.xlu0 %1047 }
 0x3b7   :  { %v1053_v59 = vsel %vm1051_vm11, %v1044_v46, %v1048_v26  ;;  %v1055_v51 = vsel %vm1051_vm11, %v1048_v26, %v1044_v46 }
 0x3b8   :  { %v1058_v45 = vmax.f32 %v3691_v25, %v1055_v51  ;;  %v1059_v0 = vmax.f32 %v3697_v9, %v1053_v59 }
 0x3ba   :  { %1062 = vrot.lane.b32.xlu1 %v1058_v45, %s2489_s22  ;;  %1066 = vrot.lane.b32.xlu0 %v1059_v0, %s2489_s22 }
 0x3f0   :  { %v2083_v63 = vpop.f32.mrb[4].mxu0 }
 0x3f1   :  { %v2084_v60 = vpop.f32.mrb[5].mxu0 }
 0x3f2   :  { %v3745_v19 = vadd.f32 %v2084_v60, %v2083_v63  ;;  %v2279_v63 = vpack.c.bf16 %v3361_v20, %v3356_v53  ;;  %v4113_v20 = vpack.c.bf16 %v2971_v14, %v2966_v13  ;;  %v143_v13 = vld [vmem:[%s4010_s2 + $0x1a8] sm:$0xff]  ;;  %v144_v14 = vld [vmem:[%s4010_s2 + $0x1b8] sm:$0xff] }
 0x406   :  { %v1061_v30 = vpop.permute.xlu1 %1060  ;;  %v1065_v8 = vpop.permute.xlu0 %1064 }
 0x407   :  { %v1069_v35 = vsel %vm1068_vm12, %v1061_v30, %v1065_v8  ;;  %v1071_v2 = vsel %vm1068_vm12, %v1065_v8, %v1061_v30  ;;  %v4111_v30 = vpack.c.bf16 %v2945_v7, %v2940_v6  ;;  %v4112_v6 = vpack.c.bf16 %v2933_v1, %v2928_v4  ;;  %v141_v4 = vld [vmem:[%s4010_s2 + $0x188] sm:$0xff]  ;;  %v142_v1 = vld [vmem:[%s4010_s2 + $0x198] sm:$0xff] }
 0x408   :  { %v1073_v11 = vmax.f32 %v1056_v52, %v1071_v2  ;;  %v1074_v62 = vmax.f32 %v1057_v55, %v1069_v35  ;;  %v2287_v7 = vpack.c.bf16 %v3589_v10, %v3584_v22  ;;  %v2291_v2 = vpack.c.bf16 %v142_v1, %v141_v4  ;;  %v4117_v22 = vld [vmem:[#allocation7_spill] sm:$0xff]  ;;  %v4118_v10 = vld [vmem:[#allocation6_spill] sm:$0xff] }
 0x40a   :  { %v1077_v43 = vmax.f32 %v1073_v11, %v1074_v62  ;;  %v4119_v11 = vpack.c.bf16 %v4117_v22, %v4118_v10  ;;  %v2295_v62 = vpack.c.bf16 %v144_v14, %v143_v13 }
 0x40c   :  { %v1079_v31 = vsub.f32 %v3606_v54, %v1077_v43  ;;  %v1080_v33 = vsub.f32 %v3611_v27, %v1077_v43  ;;  %v4120_v43 = vld [vmem:[#allocation5_spill] sm:$0xff] }
 0x40e   :  { %v1083_v56 = vmul.f32 1.442695, %v1079_v31  ;;  %v1085_v40 = vmul.f32 1.442695, %v1080_v33  ;;  %v4121_v31 = vld [vmem:[#allocation4_spill] sm:$0xff] }
 0x40f   :  { %v4122_v33 = vpack.c.bf16 %v4120_v43, %v4121_v31 }
 0x410   :  { %2474 = vpow2.f32 %v1083_v56  ;;  %v145_v56 = vld [vmem:[%s4010_s2 + $0x1c8] sm:$0xff] }
 0x411   :  { %2476 = vpow2.f32 %v1085_v40  ;;  %v146_v40 = vld [vmem:[%s4010_s2 + $0x1d8] sm:$0xff] }
 0x41a   :  { %v3754_v12 = vpop.eup %2474 }
 0x41b   :  { %v3756_v38 = vpop.eup %2476  ;;  %1091 = vrot.lane.b32.xlu1 %v3754_v12, %s2490_s5 }
 0x41c   :  { %1095 = vrot.lane.b32.xlu0 %v3756_v38, %s2490_s5 }
 0x421   :  { %v2086_v21 = vpop.f32.mrb[6].mxu0 }
 0x422   :  { %v2087_v5 = vpop.f32.mrb[7].mxu0 }
 0x423   :  { %v3762_v39 = vadd.f32 %v2087_v5, %v2086_v21  ;;  %v2299_v5 = vpack.c.bf16 %v146_v40, %v145_v56 }
 0x42c   :  { %v1063_v54 = vpop.permute.xlu1 %1062  ;;  %v1067_v27 = vpop.permute.xlu0 %1066 }
 0x42d   :  { %v1070_v28 = vsel %vm1068_vm12, %v1063_v54, %v1067_v27  ;;  %v1072_v36 = vsel %vm1068_vm12, %v1067_v27, %v1063_v54 }
 0x42e   :  { %v1075_v49 = vmax.f32 %v1058_v45, %v1072_v36  ;;  %v1076_v42 = vmax.f32 %v1059_v0, %v1070_v28  ;;  %v2275_v0 = vpack.c.bf16 %v3281_v15, %v3276_v29  ;;  %v2283_v29 = vpack.c.bf16 %v3502_v17, %v3497_v50  ;;  %v4114_v50 = vld [vmem:[#allocation3_spill] sm:$0xff]  ;;  %v4115_v17 = vld [vmem:[#allocation2_spill] sm:$0xff] }
 0x42f   :  { %v4116_v35 = vpack.c.bf16 %v4114_v50, %v4115_v17 }
 0x430   :  { %v1078_v52 = vmax.f32 %v1075_v49, %v1076_v42  ;;  %2276 = vmatprep.subr.bf16.mxu1 %v2275_v0  ;;  %v4123_v42 = vld [vmem:[#allocation12_spill] sm:$0xff]  ;;  %v4130_v0 = vld [vmem:[#allocation13_spill] sm:$0xff] }
 0x431   :  { %2278 = vmatpush3.bf16.msra.mxu1 %v4111_v30  ;;  %v4133_v30 = vld [vmem:[#allocation15_spill] sm:$0xff] }
 0x432   :  { %v1081_v55 = vsub.f32 %v3691_v25, %v1078_v52  ;;  %v1082_v32 = vsub.f32 %v3697_v9, %v1078_v52  ;;  %v3781_v9 = vrot.slane %v3484_v18, %v2875_v34  ;;  %2280 = vmatprep.subr.bf16.mxu1 %v2279_v63  ;;  %v4124_v52 = vld [vmem:[#allocation11_spill] sm:$0xff]  ;;  %v4131_v63 = vld [vmem:[#allocation14_spill] sm:$0xff] }
 0x434   :  { %v1087_v41 = vmul.f32 1.442695, %v1081_v55  ;;  %v1089_v58 = vmul.f32 1.442695, %v1082_v32  ;;  %v4125_v55 = vpack.c.bf16 %v4123_v42, %v4124_v52  ;;  %v147_v32 = vld [vmem:[%s4010_s2 + $0x1e8] sm:$0xff]  ;;  %v4138_v42 = vld [vmem:[#allocation28_spill] sm:$0xff] }
 0x435   :  { %2282 = vmatpush3.bf16.msra.mxu1 %v4112_v6  ;;  %v4139_v52 = vld [vmem:[#allocation30_spill] sm:$0xff] }
 0x436   :  { %2478 = vpow2.f32 %v1087_v41  ;;  %2284 = vmatprep.subr.bf16.mxu1 %v2283_v29  ;;  %v148_v41 = vld [vmem:[%s4010_s2 + $0x1f8] sm:$0xff]  ;;  %v2456_v29 = vpack.i.bf16 %v142_v1, %v141_v4  ;;  %s2497_s2 = smov 112  }
 0x437   :  { %2480 = vpow2.f32 %v1089_v58  ;;  %v2303_v58 = vpack.c.bf16 %v148_v41, %v147_v32 }
 0x439   :  { %2286 = vmatpush3.bf16.msra.mxu1 %v4113_v20 }
 0x43a   :  { %2288 = vmatprep.subr.bf16.mxu1 %v2287_v7 }
 0x43d   :  { %2290 = vmatpush3.bf16.msra.mxu1 %v4116_v35  ;;  %v2461_v35 = vpack.i.bf16 %v144_v14, %v143_v13 }
 0x43e   :  { %2292 = vmatprep.subr.bf16.mxu1 %v2291_v2 }
 0x440   :  { %v3770_v46 = vpop.eup %2478 }
 0x441   :  { %v3772_v26 = vpop.eup %2480  ;;  %1093 = vrot.lane.b32.xlu1 %v3770_v46, %s2490_s5  ;;  %2294 = vmatpush3.bf16.msra.mxu1 %v4119_v11 }
 0x442   :  { %1097 = vrot.lane.b32.xlu0 %v3772_v26, %s2490_s5  ;;  %2296 = vmatprep.subr.bf16.mxu1 %v2295_v62 }
 0x445   :  { %2298 = vmatpush3.bf16.msra.mxu1 %v4122_v33 }
 0x446   :  { %2300 = vmatprep.subr.bf16.mxu1 %v2299_v5 }
 0x449   :  { %2302 = vmatpush3.bf16.msra.mxu1 %v4125_v55  ;;  %v4140_v55 = vld [vmem:[#allocation17_spill] sm:$0xff] }
 0x44a   :  { %2304 = vmatprep.subr.bf16.mxu1 %v2303_v58  ;;  %v4141_v58 = vld [vmem:[#allocation16_spill] sm:$0xff] }
 0x468   :  { %v1792_v59 = vpop.f32.mrb[8].mxu0 }
 0x469   :  { %1803 = vrot.lane.b32.xlu1 %v1792_v59, %s2489_s22  ;;  %v1794_v25 = vpop.f32.mrb[9].mxu0  ;;  %v4126_v59 = vld [vmem:[#allocation10_spill] sm:$0xff] }
 0x46a   :  { %v4127_v25 = vld [vmem:[#allocation9_spill] sm:$0xff] }
 0x46c   :  { %v1797_v51 = vpop.f32.mrb[10].mxu0 }
 0x46d   :  { %1816 = vrot.lane.b32.xlu1 %v3781_v9, %s2489_s22  ;;  %1805 = vrot.lane.b32.xlu0 %v1797_v51, %s2489_s22  ;;  %v1799_v45 = vpop.f32.mrb[11].mxu0  ;;  %v4128_v51 = vpack.c.bf16 %v4126_v59, %v4127_v25 }
 0x46e   :  { %v4129_v45 = vld [vmem:[#allocation29_spill] sm:$0xff] }
 0x46f   :  { %2306 = vmatpush3.bf16.msra.mxu1 %v4128_v51 }
 0x48d   :  { %v1092_v60 = vpop.permute.xlu1 %1091 }
 0x48e   :  { %v1096_v34 = vpop.permute.xlu0 %1095 }
 0x48f   :  { %v1099_v18 = vsel %vm1051_vm11, %v1092_v60, %v1096_v34  ;;  %v1101_v8 = vsel %vm1051_vm11, %v1096_v34, %v1092_v60  ;;  %v4132_v60 = vld [vmem:[#allocation18_spill] sm:$0xff]  ;;  %v4134_v34 = vld [vmem:[#allocation20_spill] sm:$0xff] }
 0x490   :  { %v3800_v15 = vadd.f32 %v3754_v12, %v1101_v8  ;;  %v3803_v53 = vadd.f32 %v3756_v38, %v1099_v18  ;;  %v4136_v18 = vld [vmem:[#allocation24_spill] sm:$0xff]  ;;  %v4137_v8 = vld [vmem:[#allocation25_spill] sm:$0xff] }
 0x492   :  { %1111 = vrot.lane.b32.xlu1 %v3803_v53, %s2489_s22  ;;  %1107 = vrot.lane.b32.xlu0 %v3800_v15, %s2489_s22 }
 0x4b3   :  { %v1094_v21 = vpop.permute.xlu1 %1093 }
 0x4b4   :  { %v1098_v54 = vpop.permute.xlu0 %1097 }
 0x4b5   :  { %v1100_v27 = vsel %vm1051_vm11, %v1094_v21, %v1098_v54  ;;  %v1102_v28 = vsel %vm1051_vm11, %v1098_v54, %v1094_v21 }
 0x4b6   :  { %v1105_v36 = vadd.f32 %v3770_v46, %v1102_v28  ;;  %v1106_v49 = vadd.f32 %v3772_v26, %v1100_v27 }
 0x4b8   :  { %1113 = vrot.lane.b32.xlu1 %v1106_v49, %s2489_s22  ;;  %1109 = vrot.lane.b32.xlu0 %v1105_v36, %s2489_s22 }
 0x4bc   :  { %433 = vrot.lane.b32.xlu1 %v4129_v45, %s2493_s1  ;;  %425 = vrot.lane.b32.xlu0 %v4130_v0, %s2489_s22 }
 0x4c0   :  { %413 = vrot.lane.b32.xlu1 %v3563_v24, %s2493_s1  ;;  %405 = vrot.lane.b32.xlu0 %v4131_v63, %s2489_s22  ;;  %v4135_v24 = vld [vmem:[#allocation21_spill] sm:$0xff] }
 0x4c4   :  { %419 = vrot.lane.b32.xlu1 %v4132_v60, %s2490_s5  ;;  %439 = vrot.lane.b32.xlu0 %v4133_v30, %s2490_s5 }
 0x4c8   :  { %435 = vrot.lane.b32.xlu1 %v3660_v48, %s2493_s1  ;;  %427 = vrot.lane.b32.xlu0 %v4134_v34, %s2489_s22 }
 0x4cc   :  { %415 = vrot.lane.b32.xlu1 %v3651_v23, %s2493_s1  ;;  %407 = vrot.lane.b32.xlu0 %v4135_v24, %s2489_s22 }
 0x4d0   :  { %421 = vrot.lane.b32.xlu1 %v4136_v18, %s2490_s5  ;;  %441 = vrot.lane.b32.xlu0 %v4137_v8, %s2490_s5 }
 0x4d4   :  { %2457 = vrot.lane.b32.xlu0 %v2456_v29, %s2493_s1 }
 0x4db   :  { %v1804_v6 = vpop.permute.xlu1 %1803 }
 0x4dc   :  { %v1809_v48 = vadd.f32 %v1804_v6, %v3068_v61 }
 0x4df   :  { %v1817_v7 = vpop.permute.xlu1 %1816  ;;  %v1806_v20 = vpop.permute.xlu0 %1805 }
 0x4e0   :  { %v1819_v50 = vadd.f32 %v1817_v7, %v1809_v48  ;;  %v1810_v23 = vadd.f32 %v1806_v20, %v2886_v44 }
 0x4e2   :  { %v1820_v17 = vadd.f32 %v1817_v7, %v1810_v23  ;;  %1823 = vrot.lane.b32.xlu1 %v1819_v50, %s2489_s22 }
 0x4e4   :  { %1825 = vrot.lane.b32.xlu0 %v1820_v17, %s2489_s22  ;;  %v4142_v17 = vld [vmem:[#allocation23_spill] sm:$0xff] }
 0x4e6   :  { %2462 = vrot.lane.b32.xlu1 %v2461_v35, %s2493_s1 }
 0x4e8   :  { %1835 = vrot.lane.b32.xlu0 %v3781_v9, %s2497_s2 }
 0x4ea   :  { %1927 = vrot.lane.b32.xlu1 %v3781_v9, %s2493_s1 }
 0x4ec   :  { %910 = vrot.lane.b32.xlu0 %v3068_v61, %s2495_s27 }
 0x4ee   :  { %912 = vrot.lane.b32.xlu1 %v2886_v44, %s2495_s27 }
 0x4f0   :  { %916 = vrot.lane.b32.xlu0 %v3068_v61, %s2498_s24 }
 0x4f2   :  { %918 = vrot.lane.b32.xlu1 %v2886_v44, %s2498_s24 }
 0x4f4   :  { %922 = vrot.lane.b32.xlu0 %v3068_v61, %s2497_s2 }
 0x4f6   :  { %924 = vrot.lane.b32.xlu1 %v2886_v44, %s2497_s2 }
 0x4f8   :  { %928 = vrot.lane.b32.xlu0 %v3068_v61, %s2488_s19 }
 0x4fa   :  { %930 = vrot.lane.b32.xlu1 %v2886_v44, %s2488_s19 }
 0x504   :  { %v1112_v9 = vpop.permute.xlu1 %1111  ;;  %v1108_v4 = vpop.permute.xlu0 %1107 }
 0x505   :  { %v1115_v1 = vsel %vm1068_vm12, %v1108_v4, %v1112_v9  ;;  %v1117_v2 = vsel %vm1068_vm12, %v1112_v9, %v1108_v4  ;;  %v4143_v4 = vld [vmem:[#allocation22_spill] sm:$0xff] }
 0x506   :  { %v1119_v13 = vadd.f32 %v1117_v2, %v3800_v15  ;;  %v1120_v14 = vadd.f32 %v1115_v1, %v3803_v53  ;;  %v904_v15 = vsel %vm161_vm1, %v3555_v16, %v3068_v61 }
 0x507   :  { %v906_v3 = vsel %vm275_vm4, %v904_v15, %v4138_v42 }
 0x508   :  { %v1123_v22 = vadd.f32 %v1120_v14, %v1119_v13 }
 0x50a   :  { %2482 = vrcp.f32 %v1123_v22 }
 0x514   :  { %v2483_v54 = vpop.eup %2482 }
 0x515   :  { %v1127_v41 = vmul.f32 %v2483_v54, %v3754_v12  ;;  %v1128_v25 = vmul.f32 %v2483_v54, %v3756_v38  ;;  %v905_v12 = vsel %vm161_vm1, %v3710_v47, %v2886_v44 }
 0x516   :  { %v907_v38 = vsel %vm275_vm4, %v905_v12, %v3681_v57 }
 0x517   :  { %v909_v50 = vsel %vm278_vm6, %v907_v38, %v3703_v37 }
 0x52a   :  { %v1114_v10 = vpop.permute.xlu1 %1113  ;;  %v1110_v11 = vpop.permute.xlu0 %1109 }
 0x52b   :  { %v1116_v62 = vsel %vm1068_vm12, %v1110_v11, %v1114_v10  ;;  %v1118_v43 = vsel %vm1068_vm12, %v1114_v10, %v1110_v11 }
 0x52c   :  { %v1121_v31 = vadd.f32 %v1118_v43, %v1105_v36  ;;  %v1122_v33 = vadd.f32 %v1116_v62, %v1106_v49  ;;  %v908_v36 = vsel %vm278_vm6, %v906_v3, %v4139_v52  ;;  %v1136_v62 = vadd.f32 1.0, %v909_v50 }
 0x52d   :  { %v1135_v63 = vadd.f32 1.0, %v908_v36 }
 0x52e   :  { %v434_v56 = vpop.permute.xlu1 %433  ;;  %v426_v40 = vpop.permute.xlu0 %425  ;;  %v1124_v21 = vadd.f32 %v1122_v33, %v1121_v31 }
 0x52f   :  { %v451_v27 = vsel %vm161_vm1, %v426_v40, %v434_v56 }
 0x530   :  { %2484 = vrcp.f32 %v1124_v21  ;;  %v453_v59 = vsel %vm275_vm4, %v451_v27, %v4141_v58 }
 0x532   :  { %v414_v53 = vpop.permute.xlu1 %413  ;;  %v406_v5 = vpop.permute.xlu0 %405 }
 0x533   :  { %v445_v28 = vsel %vm161_vm1, %v406_v5, %v414_v53 }
 0x534   :  { %v447_v32 = vsel %vm275_vm4, %v445_v28, %v4140_v55 }
 0x536   :  { %v420_v49 = vpop.permute.xlu1 %419  ;;  %v440_v51 = vpop.permute.xlu0 %439 }
 0x537   :  { %v449_v45 = vsel %vm278_vm6, %v447_v32, %v420_v49  ;;  %v455_v0 = vsel %vm278_vm6, %v453_v59, %v440_v51 }
 0x538   :  { %v1131_v60 = vmul.f32 %v1127_v41, %v449_v45  ;;  %v1132_v30 = vmul.f32 %v1128_v25, %v455_v0 }
 0x53a   :  { %v1137_v34 = vmul.f32 %v1135_v63, %v1131_v60  ;;  %v436_v24 = vpop.permute.xlu1 %435  ;;  %v428_v18 = vpop.permute.xlu0 %427  ;;  %v1138_v8 = vmul.f32 %v1135_v63, %v1132_v30 }
 0x53b   :  { %v2485_v48 = vpop.eup %2484  ;;  %v452_v7 = vsel %vm161_vm1, %v428_v18, %v436_v24  ;;  %v4144_v18 = vld [vmem:[#allocation8_spill] sm:$0xff] }
 0x53c   :  { %1205 = vmatprep.mubr.f32.mxu1 %v1138_v8  ;;  %v1129_v9 = vmul.f32 %v2485_v48, %v3770_v46  ;;  %v454_v1 = vsel %vm275_vm4, %v452_v7, %v4143_v4  ;;  %v1130_v2 = vmul.f32 %v2485_v48, %v3772_v26  ;;  %v4145_v8 = vld [vmem:[#allocation26_spill] sm:$0xff] }
 0x53d   :  { %1206 = vmatmul.mubr.f32.vlgmr.msra.gmra.mrb[8].mxu1 %v1137_v34  ;;  %v1029_v12 = vmul.f32 %v4145_v8, %v4144_v18 }
 0x53e   :  { %v416_v29 = vpop.permute.xlu1 %415  ;;  %v408_v6 = vpop.permute.xlu0 %407 }
 0x53f   :  { %v446_v20 = vsel %vm161_vm1, %v408_v6, %v416_v29  ;;  %v4146_v29 = vld [vmem:[#allocation19_spill] sm:$0xff] }
 0x540   :  { %v448_v35 = vsel %vm275_vm4, %v446_v20, %v4142_v17  ;;  %v4147_v6 = vld [vmem:[#allocation27_spill] sm:$0xff] }
 0x541   :  { %v1030_v48 = vmul.f32 %v4147_v6, %v4146_v29 }
 0x542   :  { %v422_v23 = vpop.permute.xlu1 %421  ;;  %v442_v13 = vpop.permute.xlu0 %441 }
 0x543   :  { %v450_v14 = vsel %vm278_vm6, %v448_v35, %v422_v23  ;;  %v456_v22 = vsel %vm278_vm6, %v454_v1, %v442_v13 }
 0x544   :  { %v1133_v10 = vmul.f32 %v1129_v9, %v450_v14  ;;  %v1134_v11 = vmul.f32 %v1130_v2, %v456_v22 }
 0x546   :  { %v1140_v43 = vmul.f32 %v1136_v62, %v1134_v11  ;;  %v2458_v31 = vpop.permute.xlu0 %2457  ;;  %v1139_v33 = vmul.f32 %v1136_v62, %v1133_v10 }
 0x547   :  { %v2460_v56 = vunpack.i.h.bf16 %v2458_v31  ;;  %v2459_v40 = vunpack.i.l.bf16 %v2458_v31 }
 0x548   :  { %1210 = vmatprep.mubr.f32.mxu1 %v1140_v43 }
 0x549   :  { %v2343_v46 = vpack.c.bf16 %v2460_v56, %v2459_v40  ;;  %1211 = vmatmul.mubr.f32.gmra.mrb[10].mxu1 %v1139_v33 }
 0x54b   :  { %2344 = vmatprep.subr.bf16.mxu1 %v2343_v46 }
 0x54c   :  { %2346 = vmatpush3.bf16.msra.mxu1 %v2343_v46 }
 0x554   :  { %v1824_v15 = vpop.permute.xlu1 %1823 }
 0x555   :  { %2157 = vmatprep.mubr.msk.f32.mxu1 %vm563_vm2, %v1824_v15 }
 0x556   :  { %v1826_v26 = vpop.permute.xlu0 %1825 }
 0x557   :  { %2158 = vmatmul.mubr.msk.f32.vlgmr.msra.gmra.mrb[12].mxu1 %vm563_vm2, %v1826_v26 }
 0x558   :  { %v2463_v21 = vpop.permute.xlu1 %2462 }
 0x559   :  { %v2465_v53 = vunpack.i.h.bf16 %v2463_v21  ;;  %v2464_v5 = vunpack.i.l.bf16 %v2463_v21 }
 0x55a   :  { %v1836_v54 = vpop.permute.xlu0 %1835 }
 0x55b   :  { %v2347_v27 = vpack.c.bf16 %v2465_v53, %v2464_v5 }
 0x55c   :  { %v1928_v28 = vpop.permute.xlu1 %1927 }
 0x55d   :  { %2348 = vmatprep.subr.bf16.mxu1 %v2347_v27 }
 0x55e   :  { %v911_v3 = vpop.permute.xlu0 %910  ;;  %2350 = vmatpush3.bf16.msra.mxu1 %v2347_v27 }
 0x55f   :  { %v934_v49 = vsel %vm563_vm2, %v911_v3, %v4139_v52 }
 0x560   :  { %v913_v36 = vpop.permute.xlu1 %912 }
 0x561   :  { %v935_v41 = vsel %vm563_vm2, %v913_v36, %v3703_v37 }
 0x562   :  { %v917_v55 = vpop.permute.xlu0 %916 }
 0x563   :  { %v936_v32 = vsel %vm161_vm1, %v934_v49, %v917_v55 }
 0x564   :  { %v919_v58 = vpop.permute.xlu1 %918  ;;  %v938_v25 = vsel %vm568_vm3, %v936_v32, %v3555_v16 }
 0x565   :  { %v937_v59 = vsel %vm161_vm1, %v935_v41, %v919_v58 }
 0x566   :  { %v923_v51 = vpop.permute.xlu0 %922  ;;  %v939_v0 = vsel %vm568_vm3, %v937_v59, %v3710_v47 }
 0x567   :  { %v940_v45 = vsel %vm275_vm4, %v938_v25, %v923_v51 }
 0x568   :  { %v925_v63 = vpop.permute.xlu1 %924  ;;  %v942_v60 = vsel %vm573_vm5, %v940_v45, %v3068_v61 }
 0x569   :  { %v941_v52 = vsel %vm275_vm4, %v939_v0, %v925_v63 }
 0x56a   :  { %v929_v30 = vpop.permute.xlu0 %928  ;;  %v943_v16 = vsel %vm573_vm5, %v941_v52, %v2886_v44 }
 0x56b   :  { %v944_v37 = vsel %vm278_vm6, %v942_v60, %v929_v30 }
 0x56c   :  { %v946_v34 = vsel %vm578_vm7, %v944_v37, %v4138_v42  ;;  %v931_v24 = vpop.permute.xlu1 %930 }
 0x56d   :  { %v1021_v47 = vadd.f32 %v3745_v19, %v946_v34  ;;  %v945_v38 = vsel %vm278_vm6, %v943_v16, %v931_v24 }
 0x56e   :  { %v947_v61 = vsel %vm578_vm7, %v945_v38, %v3681_v57 }
 0x56f   :  { %v1031_v7 = vmul.f32 %v1029_v12, %v1021_v47  ;;  %v1026_v20 = vadd.f32 %v3762_v39, %v947_v61 }
 0x571   :  { %v1032_v50 = vmul.f32 %v1030_v48, %v1026_v20  ;;  %2023 = vst [vmem:[%s4011_s4] sm:$0xff] %v1031_v7 }
 0x573   :  { %2025 = vst [vmem:[%s4011_s4 + $0x10] sm:$0xff] %v1032_v50 }
 0x610   :  { %v2121_v44 = vpop.f32.mrb[8].mxu1 }
 0x611   :  { %v2122_v19 = vpop.f32.mrb[9].mxu1 }
 0x612   :  { %v2123_v23 = vadd.f32 %v2122_v19, %v2121_v44 }
 0x614   :  { %v1208_v31 = vadd.f32 %v2123_v23, %v4138_v42 }
 0x616   :  { %v1216_v56 = vmul.f32 %v1208_v31, %v4144_v18 }
 0x61c   :  { %v2124_v17 = vpop.f32.mrb[10].mxu1 }
 0x61d   :  { %v2125_v35 = vpop.f32.mrb[11].mxu1 }
 0x61e   :  { %v2126_v9 = vadd.f32 %v2125_v35, %v2124_v17 }
 0x620   :  { %v1213_v43 = vadd.f32 %v2126_v9, %v3681_v57 }
 0x622   :  { %v1217_v33 = vmul.f32 %v1213_v43, %v4146_v29 }
 0x62a   :  { %v2159_v4 = vpop.f32.mrb[12].mxu1 }
 0x62b   :  { %v1914_v1 = vadd.f32 %v2159_v4, %v1836_v54  ;;  %v1908_v2 = vpop.f32.mrb[13].mxu1 }
 0x62c   :  { %v1909_v13 = vadd.f32 %v1908_v2, %v1836_v54 }
 0x62d   :  { %v1918_v14 = vmax.f32 %v1914_v1, 0.0 }
 0x62e   :  { %v1917_v39 = vmax.f32 %v1909_v13, 0.0 }
 0x630   :  { %2164 = vmatprep.mubr.msk.f32.mxu1 %vm563_vm2, %v1917_v39 }
 0x631   :  { %2165 = vmatmul.mubr.msk.f32.vlgmr.msra.gmra.mrb[14].mxu1 %vm563_vm2, %v1918_v14 }
 0x704   :  { %v2166_v22 = vpop.f32.mrb[14].mxu1 }
 0x705   :  { %v2008_v10 = vadd.f32 %v2166_v22, %v1928_v28  ;;  %v2002_v11 = vpop.f32.mrb[15].mxu1 }
 0x706   :  { %v2003_v62 = vadd.f32 %v2002_v11, %v1928_v28 }
 0x707   :  { %2015 = vrot.lane.b32.xlu1 %v2008_v10, %s2490_s5 }
 0x708   :  { %2013 = vrot.lane.b32.xlu0 %v2003_v62, %s2490_s5 }
 0x779   :  { %v2016_v40 = vpop.permute.xlu1 %2015 }
 0x77a   :  { %v2020_v46 = vsel %vm161_vm1, %v1217_v33, %v2016_v40  ;;  %v2014_v15 = vpop.permute.xlu0 %2013 }
 0x77b   :  { %v2022_v26 = vsel %vm568_vm3, %v2020_v46, 0.0  ;;  %v2019_v21 = vsel %vm161_vm1, %v1216_v56, %v2014_v15 }
 0x77c   :  { %2026 = vst [vmem:[%s4011_s4 + $0x18] sm:$0xff] %v2022_v26  ;;  %v2021_v57 = vsel %vm568_vm3, %v2019_v21, 0.0 }
 0x77d   :  { %2024 = vst [vmem:[%s4011_s4 + $0x8] sm:$0xff] %v2021_v57 }

</bundles_post_ra>
